<compile_context>
chip_gen: v6e
topology: v6e:2x2x1
jax: 0.10.0
libtpu: 0.0.40
codegen_flags: <defaults>
</compile_context>

<pallas_src>
import jax
import jax.numpy as jnp
from jax.experimental import pallas as pl
from jax.experimental.pallas import tpu as pltpu

IMAGE_SIZE = 784
H_DIM = 400
Z_DIM = 20


def _round_up(x, m):
    return ((x + m - 1) // m) * m


def vae_kernel(x_ref, w1_ref, b1_ref, w2_ref, b2_ref,
               w3_ref, b3_ref, w4_ref, b4_ref, eps_ref,
               recon_ref, latent_ref):
    # ---- encoder: Linear(784->400) + LeakyReLU(0.2) + Linear(400->2*Z) ----
    x = x_ref[...]                                            # bf16 [TM, 784]
    h = jnp.dot(x, w1_ref[...], preferred_element_type=jnp.float32) + b1_ref[...]
    h = jnp.maximum(h, 0.2 * h)                               # LeakyReLU(0.2), f32 on VPU
    enc = jnp.dot(h.astype(jnp.bfloat16), w2_ref[...],
                  preferred_element_type=jnp.float32) + b2_ref[...]
    latent_ref[...] = enc                                     # fused [mu | logvar], one store

    # ---- reparameterize: z = mu + exp(0.5 * logvar) * eps ----
    mu = enc[:, :Z_DIM]
    logvar = enc[:, Z_DIM:]
    z = mu + jnp.exp(0.5 * logvar) * eps_ref[...]             # exp on EUP

    # ---- decoder: Linear(Z->400) + ReLU + Linear(400->784) + Sigmoid ----
    d = jnp.dot(z.astype(jnp.bfloat16), w3_ref[...],
                preferred_element_type=jnp.float32) + b3_ref[...]
    d = jnp.maximum(d, 0.0)                                   # ReLU
    out = jnp.dot(d.astype(jnp.bfloat16), w4_ref[...],
                  preferred_element_type=jnp.float32) + b4_ref[...]
    # sigmoid: exp and approx reciprocal both run on the EUP slot (frees VALU on the 784-lane tensor)
    recon_ref[...] = pl.reciprocal(1.0 + jnp.exp(-out), approx=True)


def vae_forward(x, params, eps, *, tm=None):
    B = x.shape[0]
    w1, b1, w2, b2, w3, b3, w4, b4 = params

    # bf16 weights / activations; matmuls still accumulate in f32 on the MXU.
    cast = lambda a: a.astype(jnp.bfloat16)
    w1b, w2b, w3b, w4b = cast(w1), cast(w2), cast(w3), cast(w4)
    xb = cast(x)
    eps = eps.astype(jnp.float32)

    if tm is None:
        kind = jax.devices()[0].device_kind.lower()
        base = 128 if "v5" in kind else 256        # v5e MXU rows = 128; v6e/v7x = 256
        tm = min(base, _round_up(B, 8))
    b_pad = _round_up(B, tm)
    if b_pad != B:
        xb = jnp.pad(xb, ((0, b_pad - B), (0, 0)))
        eps = jnp.pad(eps, ((0, b_pad - B), (0, 0)))

    grid = (b_pad // tm,)
    batch_spec = lambda cols: pl.BlockSpec((tm, cols), lambda i: (i, 0))
    # same block index every step -> weights/biases DMA'd once and stay resident in VMEM
    const_spec = lambda r, c: pl.BlockSpec((r, c), lambda i: (0, 0))

    n_mac = IMAGE_SIZE * H_DIM + H_DIM * 2 * Z_DIM + Z_DIM * H_DIM + H_DIM * IMAGE_SIZE
    weight_bytes = 2 * n_mac + 4 * (H_DIM + 2 * Z_DIM + H_DIM + IMAGE_SIZE)
    io_bytes = b_pad * (2 * IMAGE_SIZE            # bf16 x in
                        + 4 * Z_DIM               # f32 eps in
                        + 4 * IMAGE_SIZE          # f32 recon out
                        + 4 * 2 * Z_DIM)          # f32 latent out

    recon, latent = pl.pallas_call(
        vae_kernel,
        grid=grid,
        out_shape=(
            jax.ShapeDtypeStruct((b_pad, IMAGE_SIZE), jnp.float32),   # reconstruction
            jax.ShapeDtypeStruct((b_pad, 2 * Z_DIM), jnp.float32),    # fused [mu | logvar]
        ),
        in_specs=[
            batch_spec(IMAGE_SIZE),              # x
            const_spec(IMAGE_SIZE, H_DIM),       # w1
            const_spec(1, H_DIM),                # b1
            const_spec(H_DIM, 2 * Z_DIM),        # w2
            const_spec(1, 2 * Z_DIM),            # b2
            const_spec(Z_DIM, H_DIM),            # w3
            const_spec(1, H_DIM),                # b3
            const_spec(H_DIM, IMAGE_SIZE),       # w4
            const_spec(1, IMAGE_SIZE),           # b4
            batch_spec(Z_DIM),                   # eps
        ],
        out_specs=(batch_spec(IMAGE_SIZE), batch_spec(2 * Z_DIM)),
        compiler_params=pltpu.CompilerParams(
            dimension_semantics=("parallel",)),
        cost_estimate=pl.CostEstimate(
            flops=2 * b_pad * n_mac,
            transcendentals=b_pad * (Z_DIM + 2 * IMAGE_SIZE),
            bytes_accessed=weight_bytes + io_bytes),
    )(xb, w1b, b1, w2b, b2, w3b, b3, w4b, b4, eps)

    recon = recon[:B]
    mu = latent[:B, :Z_DIM]
    logvar = latent[:B, Z_DIM:]
    return recon, mu, logvar


def init_linear(key, fan_in, fan_out):
    # PyTorch nn.Linear default init: U(-1/sqrt(fan_in), 1/sqrt(fan_in)).
    kw, kb = jax.random.split(key)
    bound = 1.0 / (fan_in ** 0.5)
    # stored as [in, out] (transposed vs. PyTorch's [out, in]) so the kernel does x @ W
    w = jax.random.uniform(kw, (fan_in, fan_out), jnp.float32, -bound, bound)
    b = jax.random.uniform(kb, (1, fan_out), jnp.float32, -bound, bound)
    return w, b


def reference_forward(x, params, eps):
    # Pure-JAX reference with the same bf16 weight cast / f32 accumulation as the kernel.
    w1, b1, w2, b2, w3, b3, w4, b4 = params
    cast = lambda a: a.astype(jnp.bfloat16)
    h = jnp.dot(cast(x), cast(w1), preferred_element_type=jnp.float32) + b1
    h = jnp.maximum(h, 0.2 * h)
    enc = jnp.dot(cast(h), cast(w2), preferred_element_type=jnp.float32) + b2
    mu, logvar = enc[:, :Z_DIM], enc[:, Z_DIM:]
    z = mu + jnp.exp(0.5 * logvar) * eps
    d = jnp.maximum(jnp.dot(cast(z), cast(w3), preferred_element_type=jnp.float32) + b3, 0.0)
    recon = jax.nn.sigmoid(jnp.dot(cast(d), cast(w4), preferred_element_type=jnp.float32) + b4)
    return recon, mu, logvar


if __name__ == "__main__":
    key = jax.random.PRNGKey(0)
    k_x, k_eps, k1, k2, k3, k4 = jax.random.split(key, 6)

    B = 2
    x = jax.random.uniform(k_x, (B, IMAGE_SIZE), jnp.float32)   # MNIST-like flattened input
    eps = jax.random.normal(k_eps, (B, Z_DIM), jnp.float32)     # noise for reparameterization
    # TODO(synk): torch.randn is drawn inside the PyTorch forward; here eps is passed in explicitly
    # (could be drawn in-kernel with pltpu.prng_seed/stateful_normal, but explicit eps keeps it testable).

    w1, b1 = init_linear(k1, IMAGE_SIZE, H_DIM)
    w2, b2 = init_linear(k2, H_DIM, Z_DIM * 2)
    w3, b3 = init_linear(k3, Z_DIM, H_DIM)
    w4, b4 = init_linear(k4, H_DIM, IMAGE_SIZE)
    params = (w1, b1, w2, b2, w3, b3, w4, b4)

    recon, mu, logvar = vae_forward(x, params, eps)
    jax.block_until_ready((recon, mu, logvar))

    # sanity check against pure-JAX reference (same bf16 cast; approx sigmoid reciprocal in-kernel)
    ref_recon, ref_mu, ref_logvar = reference_forward(x, params, eps)
    assert recon.shape == (B, IMAGE_SIZE)
    assert mu.shape == (B, Z_DIM) and logvar.shape == (B, Z_DIM)
    assert jnp.allclose(recon, ref_recon, atol=1e-2)
    assert jnp.allclose(mu, ref_mu, atol=5e-3)
    assert jnp.allclose(logvar, ref_logvar, atol=5e-3)

    print("KERNEL_OK")
</pallas_src>

<mosaic_0001>
module attributes {stable_mosaic.version = 11 : i64} {
  func.func @vae_kernel(%arg0: i32, %arg1: memref<8x784xbf16, #tpu.memory_space<vmem>>, %arg2: memref<784x400xbf16, #tpu.memory_space<vmem>>, %arg3: memref<1x400xf32, #tpu.memory_space<vmem>>, %arg4: memref<400x40xbf16, #tpu.memory_space<vmem>>, %arg5: memref<1x40xf32, #tpu.memory_space<vmem>>, %arg6: memref<20x400xbf16, #tpu.memory_space<vmem>>, %arg7: memref<1x400xf32, #tpu.memory_space<vmem>>, %arg8: memref<400x784xbf16, #tpu.memory_space<vmem>>, %arg9: memref<1x784xf32, #tpu.memory_space<vmem>>, %arg10: memref<8x20xf32, #tpu.memory_space<vmem>>, %arg11: memref<8x784xf32, #tpu.memory_space<vmem>>, %arg12: memref<8x40xf32, #tpu.memory_space<vmem>>) attributes {dimension_semantics = [#tpu.dimension_semantics<parallel>], iteration_bounds = array<i64: 1>, scalar_prefetch = 0 : i64, scratch_operands = 0 : i64, tpu.core_type = #tpu.core_type<tc>, window_params = [{transform_indices = @transform_0, window_bounds = array<i64: 8, 784>}, {pipeline_mode = #tpu.pipeline_mode<synchronous>, transform_indices = @transform_1, window_bounds = array<i64: 784, 400>}, {pipeline_mode = #tpu.pipeline_mode<synchronous>, transform_indices = @transform_2, window_bounds = array<i64: 1, 400>}, {pipeline_mode = #tpu.pipeline_mode<synchronous>, transform_indices = @transform_3, window_bounds = array<i64: 400, 40>}, {pipeline_mode = #tpu.pipeline_mode<synchronous>, transform_indices = @transform_4, window_bounds = array<i64: 1, 40>}, {pipeline_mode = #tpu.pipeline_mode<synchronous>, transform_indices = @transform_5, window_bounds = array<i64: 20, 400>}, {pipeline_mode = #tpu.pipeline_mode<synchronous>, transform_indices = @transform_6, window_bounds = array<i64: 1, 400>}, {pipeline_mode = #tpu.pipeline_mode<synchronous>, transform_indices = @transform_7, window_bounds = array<i64: 400, 784>}, {pipeline_mode = #tpu.pipeline_mode<synchronous>, transform_indices = @transform_8, window_bounds = array<i64: 1, 784>}, {transform_indices = @transform_9, window_bounds = array<i64: 8, 20>}, {transform_indices = @transform_10, window_bounds = array<i64: 8, 784>}, {transform_indices = @transform_11, window_bounds = array<i64: 8, 40>}]} {
    %c0 = arith.constant 0 : index
    %c0_0 = arith.constant 0 : index
    %0 = vector.load %arg1[%c0, %c0_0] : memref<8x784xbf16, #tpu.memory_space<vmem>>, vector<8x784xbf16>
    %c0_1 = arith.constant 0 : index
    %c0_2 = arith.constant 0 : index
    %1 = vector.load %arg2[%c0_1, %c0_2] : memref<784x400xbf16, #tpu.memory_space<vmem>>, vector<784x400xbf16>
    %cst = arith.constant dense<0.000000e+00> : vector<8x400xf32>
    %2 = tpu.matmul %0, %1, %cst {dimension_numbers = #tpu.dot_dimension_numbers<[1], [0], [0], [1], [0, 0, 1, 1], [], []>} : vector<8x784xbf16>, vector<784x400xbf16>, vector<8x400xf32> -> vector<8x400xf32>
    %c0_3 = arith.constant 0 : index
    %c0_4 = arith.constant 0 : index
    %3 = vector.load %arg3[%c0_3, %c0_4] : memref<1x400xf32, #tpu.memory_space<vmem>>, vector<1x400xf32>
    %4 = vector.broadcast %3 : vector<1x400xf32> to vector<8x400xf32>
    %5 = arith.addf %2, %4 : vector<8x400xf32>
    %cst_5 = arith.constant 2.000000e-01 : f32
    %6 = vector.broadcast %cst_5 : f32 to vector<8x400xf32>
    %7 = arith.mulf %6, %5 : vector<8x400xf32>
    %8 = arith.maximumf %5, %7 : vector<8x400xf32>
    %9 = arith.truncf %8 : vector<8x400xf32> to vector<8x400xbf16>
    %c0_6 = arith.constant 0 : index
    %c0_7 = arith.constant 0 : index
    %10 = vector.load %arg4[%c0_6, %c0_7] : memref<400x40xbf16, #tpu.memory_space<vmem>>, vector<400x40xbf16>
    %cst_8 = arith.constant dense<0.000000e+00> : vector<8x40xf32>
    %11 = tpu.matmul %9, %10, %cst_8 {dimension_numbers = #tpu.dot_dimension_numbers<[1], [0], [0], [1], [0, 0, 1, 1], [], []>} : vector<8x400xbf16>, vector<400x40xbf16>, vector<8x40xf32> -> vector<8x40xf32>
    %c0_9 = arith.constant 0 : index
    %c0_10 = arith.constant 0 : index
    %12 = vector.load %arg5[%c0_9, %c0_10] : memref<1x40xf32, #tpu.memory_space<vmem>>, vector<1x40xf32>
    %13 = vector.broadcast %12 : vector<1x40xf32> to vector<8x40xf32>
    %14 = arith.addf %11, %13 : vector<8x40xf32>
    %c0_11 = arith.constant 0 : index
    %c0_12 = arith.constant 0 : index
    %15 = vector.load %arg12[%c0_11, %c0_12] : memref<8x40xf32, #tpu.memory_space<vmem>>, vector<8x40xf32>
    tpu.vector_store %arg12[%c0_11, %c0_12], %14 {strides = array<i32>} : memref<8x40xf32, #tpu.memory_space<vmem>>, vector<8x40xf32>,
    %16 = vector.extract_strided_slice %14 {offsets = [0, 0], sizes = [8, 20], strides = [1, 1]} : vector<8x40xf32> to vector<8x20xf32>
    %17 = vector.extract_strided_slice %14 {offsets = [0, 20], sizes = [8, 20], strides = [1, 1]} : vector<8x40xf32> to vector<8x20xf32>
    %cst_13 = arith.constant 5.000000e-01 : f32
    %18 = vector.broadcast %cst_13 : f32 to vector<8x20xf32>
    %19 = arith.mulf %18, %17 : vector<8x20xf32>
    %20 = math.exp %19 : vector<8x20xf32>
    %c0_14 = arith.constant 0 : index
    %c0_15 = arith.constant 0 : index
    %21 = vector.load %arg10[%c0_14, %c0_15] : memref<8x20xf32, #tpu.memory_space<vmem>>, vector<8x20xf32>
    %22 = arith.mulf %20, %21 : vector<8x20xf32>
    %23 = arith.addf %16, %22 : vector<8x20xf32>
    %24 = arith.truncf %23 : vector<8x20xf32> to vector<8x20xbf16>
    %c0_16 = arith.constant 0 : index
    %c0_17 = arith.constant 0 : index
    %25 = vector.load %arg6[%c0_16, %c0_17] : memref<20x400xbf16, #tpu.memory_space<vmem>>, vector<20x400xbf16>
    %cst_18 = arith.constant dense<0.000000e+00> : vector<8x400xf32>
    %26 = tpu.matmul %24, %25, %cst_18 {dimension_numbers = #tpu.dot_dimension_numbers<[1], [0], [0], [1], [0, 0, 1, 1], [], []>} : vector<8x20xbf16>, vector<20x400xbf16>, vector<8x400xf32> -> vector<8x400xf32>
    %c0_19 = arith.constant 0 : index
    %c0_20 = arith.constant 0 : index
    %27 = vector.load %arg7[%c0_19, %c0_20] : memref<1x400xf32, #tpu.memory_space<vmem>>, vector<1x400xf32>
    %28 = vector.broadcast %27 : vector<1x400xf32> to vector<8x400xf32>
    %29 = arith.addf %26, %28 : vector<8x400xf32>
    %cst_21 = arith.constant 0.000000e+00 : f32
    %30 = vector.broadcast %cst_21 : f32 to vector<8x400xf32>
    %31 = arith.maximumf %29, %30 : vector<8x400xf32>
    %32 = arith.truncf %31 : vector<8x400xf32> to vector<8x400xbf16>
    %c0_22 = arith.constant 0 : index
    %c0_23 = arith.constant 0 : index
    %33 = vector.load %arg8[%c0_22, %c0_23] : memref<400x784xbf16, #tpu.memory_space<vmem>>, vector<400x784xbf16>
    %cst_24 = arith.constant dense<0.000000e+00> : vector<8x784xf32>
    %34 = tpu.matmul %32, %33, %cst_24 {dimension_numbers = #tpu.dot_dimension_numbers<[1], [0], [0], [1], [0, 0, 1, 1], [], []>} : vector<8x400xbf16>, vector<400x784xbf16>, vector<8x784xf32> -> vector<8x784xf32>
    %c0_25 = arith.constant 0 : index
    %c0_26 = arith.constant 0 : index
    %35 = vector.load %arg9[%c0_25, %c0_26] : memref<1x784xf32, #tpu.memory_space<vmem>>, vector<1x784xf32>
    %36 = vector.broadcast %35 : vector<1x784xf32> to vector<8x784xf32>
    %37 = arith.addf %34, %36 : vector<8x784xf32>
    %cst_27 = arith.constant 0.000000e+00 : f32
    %38 = vector.broadcast %cst_27 : f32 to vector<8x784xf32>
    %39 = arith.subf %38, %37 : vector<8x784xf32>
    %40 = math.exp %39 : vector<8x784xf32>
    %cst_28 = arith.constant 1.000000e+00 : f32
    %41 = vector.broadcast %cst_28 : f32 to vector<8x784xf32>
    %42 = arith.addf %41, %40 : vector<8x784xf32>
    %43 = tpu.reciprocal %42 {approx = true} : vector<8x784xf32> -> vector<8x784xf32>
    %c0_29 = arith.constant 0 : index
    %c0_30 = arith.constant 0 : index
    %44 = vector.load %arg11[%c0_29, %c0_30] : memref<8x784xf32, #tpu.memory_space<vmem>>, vector<8x784xf32>
    tpu.vector_store %arg11[%c0_29, %c0_30], %43 {strides = array<i32>} : memref<8x784xf32, #tpu.memory_space<vmem>>, vector<8x784xf32>,
    return
  }
  func.func @transform_0(%arg0: i32) -> (i32, i32) {
    %c0_i32 = arith.constant 0 : i32
    %c0_i32_0 = arith.constant 0 : i32
    return %arg0, %c0_i32 : i32, i32
  }
  func.func @transform_1(%arg0: i32) -> (i32, i32) {
    %c0_i32 = arith.constant 0 : i32
    %c0_i32_0 = arith.constant 0 : i32
    %c0_i32_1 = arith.constant 0 : i32
    return %c0_i32, %c0_i32_0 : i32, i32
  }
  func.func @transform_2(%arg0: i32) -> (i32, i32) {
    %c0_i32 = arith.constant 0 : i32
    %c0_i32_0 = arith.constant 0 : i32
    %c0_i32_1 = arith.constant 0 : i32
    return %c0_i32, %c0_i32_0 : i32, i32
  }
  func.func @transform_3(%arg0: i32) -> (i32, i32) {
    %c0_i32 = arith.constant 0 : i32
    %c0_i32_0 = arith.constant 0 : i32
    %c0_i32_1 = arith.constant 0 : i32
    return %c0_i32, %c0_i32_0 : i32, i32
  }
  func.func @transform_4(%arg0: i32) -> (i32, i32) {
    %c0_i32 = arith.constant 0 : i32
    %c0_i32_0 = arith.constant 0 : i32
    %c0_i32_1 = arith.constant 0 : i32
    return %c0_i32, %c0_i32_0 : i32, i32
  }
  func.func @transform_5(%arg0: i32) -> (i32, i32) {
    %c0_i32 = arith.constant 0 : i32
    %c0_i32_0 = arith.constant 0 : i32
    %c0_i32_1 = arith.constant 0 : i32
    return %c0_i32, %c0_i32_0 : i32, i32
  }
  func.func @transform_6(%arg0: i32) -> (i32, i32) {
    %c0_i32 = arith.constant 0 : i32
    %c0_i32_0 = arith.constant 0 : i32
    %c0_i32_1 = arith.constant 0 : i32
    return %c0_i32, %c0_i32_0 : i32, i32
  }
  func.func @transform_7(%arg0: i32) -> (i32, i32) {
    %c0_i32 = arith.constant 0 : i32
    %c0_i32_0 = arith.constant 0 : i32
    %c0_i32_1 = arith.constant 0 : i32
    return %c0_i32, %c0_i32_0 : i32, i32
  }
  func.func @transform_8(%arg0: i32) -> (i32, i32) {
    %c0_i32 = arith.constant 0 : i32
    %c0_i32_0 = arith.constant 0 : i32
    %c0_i32_1 = arith.constant 0 : i32
    return %c0_i32, %c0_i32_0 : i32, i32
  }
  func.func @transform_9(%arg0: i32) -> (i32, i32) {
    %c0_i32 = arith.constant 0 : i32
    %c0_i32_0 = arith.constant 0 : i32
    return %arg0, %c0_i32 : i32, i32
  }
  func.func @transform_10(%arg0: i32) -> (i32, i32) {
    %c0_i32 = arith.constant 0 : i32
    %c0_i32_0 = arith.constant 0 : i32
    return %arg0, %c0_i32 : i32, i32
  }
  func.func @transform_11(%arg0: i32) -> (i32, i32) {
    %c0_i32 = arith.constant 0 : i32
    %c0_i32_0 = arith.constant 0 : i32
    return %arg0, %c0_i32 : i32, i32
  }
}

</mosaic_0001>

<bundles_post_ra>
// kernel: tpu_custom_call.1
= control target key start
LH: loop header
LB: loop body
LE: loop exit
PB: predicated region body
PF: predicated region fallthrough
CT: control target
= control target key end

     0   :  { %17 = vsyncpa [#allocation3], 0  ;;  %vm1266_vm0 = vcmask 130048   ;;  %s6195_s0 = inlined_call_operand.vmem [shape: bf16[8,784], index: 0, kind: input, shape index: {}]   ;;  %s6196_s1 = inlined_call_operand.vmem [shape: bf16[784,400], index: 1, kind: input, shape index: {}]   ;;  %s6197_s2 = inlined_call_operand.vmem [shape: f32[1,400], index: 2, kind: input, shape index: {}]   ;;  %s6198_s3 = inlined_call_operand.vmem [shape: bf16[400,40], index: 3, kind: input, shape index: {}]   ;;  %s6199_s4 = inlined_call_operand.vmem [shape: f32[1,40], index: 4, kind: input, shape index: {}]   ;;  %s6200_s5 = inlined_call_operand.vmem [shape: bf16[20,400], index: 5, kind: input, shape index: {}]   ;;  %s6201_s6 = inlined_call_operand.vmem [shape: f32[1,400], index: 6, kind: input, shape index: {}]   ;;  %s6202_s7 = inlined_call_operand.vmem [shape: bf16[400,784], index: 7, kind: input, shape index: {}]   ;;  %s6203_s8 = inlined_call_operand.vmem [shape: f32[1,784], index: 8, kind: input, shape index: {}]   ;;  %s6204_s9 = inlined_call_operand.vmem [shape: f32[8,20], index: 9, kind: input, shape index: {}]   ;;  %s6205_s10 = inlined_call_operand.hbm [shape: f32[8,784], index: 10, kind: output, shape index: {0}]   ;;  %s6206_s11 = inlined_call_operand.hbm [shape: f32[8,40], index: 11, kind: output, shape index: {1}]  }
   0x1   :  { %v4090_v0 = vld [vmem:[%s6196_s1 + $0xe4] ss:$16 sps:$4 sm:$0xff]   ;;  %v4094_v2 = vld [vmem:[%s6196_s1 + $0xe0] ss:$16 sps:$4 sm:$0xff]   ;;  %v41_v48 = vld [vmem:[%s6195_s0 + $0x8] sm:$0xff] }
   0x2   :  { %v4092_v1 = vld [vmem:[%s6196_s1 + $0x2e4] ss:$16 sps:$4 sm:$0xff]   ;;  %1270 = vmatprep.subr.bf16.mxu0 %v4090_v0  ;;  %v4095_v3 = vld [vmem:[%s6196_s1 + $0x2e0] ss:$16 sps:$4 sm:$0xff]   ;;  %v4968_v51 = vcombine.high %v41_v48, %v41_v48 }
   0x3   :  { %1311 = vmatprep.subr.bf16.mxu1 %v4092_v1  ;;  %v4096_v4 = vld [vmem:[%s6196_s1 + $0xc4] ss:$16 sps:$4 sm:$0xff]   ;;  %1271 = vmatpush1.bf16.msra.mxu0 %v4094_v2  ;;  %v4100_v6 = vld [vmem:[%s6196_s1 + $0xc0] ss:$16 sps:$4 sm:$0xff]  }
   0x4   :  { %1312 = vmatpush1.bf16.msra.mxu1 %v4095_v3  ;;  %v4098_v5 = vld [vmem:[%s6196_s1 + $0x2c4] ss:$16 sps:$4 sm:$0xff]   ;;  %1272 = vmatprep.subr.bf16.mxu0 %v4096_v4  ;;  %v4101_v7 = vld [vmem:[%s6196_s1 + $0x2c0] ss:$16 sps:$4 sm:$0xff]  }
   0x5   :  { %1313 = vmatprep.subr.bf16.mxu1 %v4098_v5  ;;  %v4102_v8 = vld [vmem:[%s6196_s1 + $0xa4] ss:$16 sps:$4 sm:$0xff]   ;;  %v4106_v10 = vld [vmem:[%s6196_s1 + $0xa0] ss:$16 sps:$4 sm:$0xff]   ;;  %1343 = vmatprep.mubr.bf16.mxu1 %v4968_v51 }
   0x6   :  { %v4104_v9 = vld [vmem:[%s6196_s1 + $0x2a4] ss:$16 sps:$4 sm:$0xff]   ;;  %v4107_v11 = vld [vmem:[%s6196_s1 + $0x2a0] ss:$16 sps:$4 sm:$0xff]  }
   0x7   :  { %1273 = vmatpush1.bf16.msra.mxu0 %v4100_v6  ;;  %v4108_v12 = vld [vmem:[%s6196_s1 + $0x84] ss:$16 sps:$4 sm:$0xff]   ;;  %v4112_v14 = vld [vmem:[%s6196_s1 + $0x80] ss:$16 sps:$4 sm:$0xff]  }
   0x8   :  { %1314 = vmatpush1.bf16.msra.mxu1 %v4101_v7  ;;  %1274 = vmatprep.subr.bf16.mxu0 %v4102_v8  ;;  %v4110_v13 = vld [vmem:[%s6196_s1 + $0x284] ss:$16 sps:$4 sm:$0xff]   ;;  %v4113_v15 = vld [vmem:[%s6196_s1 + $0x280] ss:$16 sps:$4 sm:$0xff]   ;;  %v5028_v7 = vcombine.low %v41_v48, %v41_v48  ;;  %v4250_v48 = vld [vmem:[%s6196_s1 + $0x1ec] ss:$16 sps:$4 sm:$0xff]  }
   0x9   :  { %1315 = vmatprep.subr.bf16.mxu1 %v4104_v9  ;;  %v4114_v16 = vld [vmem:[%s6196_s1 + $0x64] ss:$16 sps:$4 sm:$0xff]   ;;  %v4118_v18 = vld [vmem:[%s6196_s1 + $0x60] ss:$16 sps:$4 sm:$0xff]  }
   0xa   :  { %v4116_v17 = vld [vmem:[%s6196_s1 + $0x264] ss:$16 sps:$4 sm:$0xff]   ;;  %v4119_v19 = vld [vmem:[%s6196_s1 + $0x260] ss:$16 sps:$4 sm:$0xff]  }
   0xb   :  { %1275 = vmatpush1.bf16.msra.mxu0 %v4106_v10  ;;  %v4120_v20 = vld [vmem:[%s6196_s1 + $0x44] ss:$16 sps:$4 sm:$0xff]   ;;  %v4124_v22 = vld [vmem:[%s6196_s1 + $0x40] ss:$16 sps:$4 sm:$0xff]  }
   0xc   :  { %1316 = vmatpush1.bf16.msra.mxu1 %v4107_v11  ;;  %1276 = vmatprep.subr.bf16.mxu0 %v4108_v12  ;;  %v4122_v21 = vld [vmem:[%s6196_s1 + $0x244] ss:$16 sps:$4 sm:$0xff]   ;;  %v4125_v23 = vld [vmem:[%s6196_s1 + $0x240] ss:$16 sps:$4 sm:$0xff]   ;;  %v4201_v11 = vld [vmem:[%s6196_s1 + $0xec] ss:$16 sps:$4 sm:$0xff]  }
   0xd   :  { %1317 = vmatprep.subr.bf16.mxu1 %v4110_v13  ;;  %v4126_v24 = vld [vmem:[%s6196_s1 + $0x24] ss:$16 sps:$4 sm:$0xff]   ;;  %v4130_v26 = vld [vmem:[%s6196_s1 + $0x20] ss:$16 sps:$4 sm:$0xff]   ;;  %v4751_v13 = vmov 0  }
   0xe   :  { %v4128_v25 = vld [vmem:[%s6196_s1 + $0x224] ss:$16 sps:$4 sm:$0xff]   ;;  %v4131_v27 = vld [vmem:[%s6196_s1 + $0x220] ss:$16 sps:$4 sm:$0xff]  }
   0xf   :  { %1277 = vmatpush1.bf16.msra.mxu0 %v4112_v14  ;;  %v4132_v28 = vld [vmem:[%s6196_s1 + $0x4] ss:$16 sps:$4 sm:$0xff]   ;;  %v4136_v30 = vld [vmem:[%s6196_s1] ss:$16 sps:$4 sm:$0xff]  }
  0x10   :  { %1318 = vmatpush1.bf16.msra.mxu1 %v4113_v15  ;;  %1278 = vmatprep.subr.bf16.mxu0 %v4114_v16  ;;  %v4134_v29 = vld [vmem:[%s6196_s1 + $0x204] ss:$16 sps:$4 sm:$0xff]   ;;  %v4137_v31 = vld [vmem:[%s6196_s1 + $0x200] ss:$16 sps:$4 sm:$0xff]   ;;  %v4199_v15 = vld [vmem:[%s6196_s1 + $0xe8] ss:$16 sps:$4 sm:$0xff]  }
  0x11   :  { %1319 = vmatprep.subr.bf16.mxu1 %v4116_v17  ;;  %v4138_v32 = vld [vmem:[%s6196_s1 + $0x1e4] ss:$16 sps:$4 sm:$0xff]   ;;  %v4142_v34 = vld [vmem:[%s6196_s1 + $0x1e0] ss:$16 sps:$4 sm:$0xff]   ;;  %v4205_v17 = vld [vmem:[%s6195_s0 + $0x18] ss:$0 sps:$4 sm:$0xff]  }
  0x12   :  { %v4140_v33 = vld [vmem:[%s6196_s1 + $0x3e4] ss:$16 sps:$4 sm:$0xff]   ;;  %v4143_v35 = vld [vmem:[%s6196_s1 + $0x3e0] ss:$16 sps:$4 sm:$0xff]  }
  0x13   :  { %1279 = vmatpush1.bf16.msra.mxu0 %v4118_v18  ;;  %v4144_v36 = vld [vmem:[%s6196_s1 + $0x1c4] ss:$16 sps:$4 sm:$0xff]   ;;  %v4148_v38 = vld [vmem:[%s6196_s1 + $0x1c0] ss:$16 sps:$4 sm:$0xff]   ;;  %v4208_v18 = vld [vmem:[%s6196_s1 + $0xcc] ss:$16 sps:$4 sm:$0xff]  }
  0x14   :  { %1320 = vmatpush1.bf16.msra.mxu1 %v4119_v19  ;;  %1280 = vmatprep.subr.bf16.mxu0 %v4120_v20  ;;  %v4146_v37 = vld [vmem:[%s6196_s1 + $0x3c4] ss:$16 sps:$4 sm:$0xff]   ;;  %v4149_v39 = vld [vmem:[%s6196_s1 + $0x3c0] ss:$16 sps:$4 sm:$0xff]   ;;  %v4206_v20 = vld [vmem:[%s6196_s1 + $0xc8] ss:$16 sps:$4 sm:$0xff]  }
  0x15   :  { %1321 = vmatprep.subr.bf16.mxu1 %v4122_v21  ;;  %v4150_v40 = vld [vmem:[%s6196_s1 + $0x1a4] ss:$16 sps:$4 sm:$0xff]   ;;  %v4154_v42 = vld [vmem:[%s6196_s1 + $0x1a0] ss:$16 sps:$4 sm:$0xff]  }
  0x16   :  { %v4152_v41 = vld [vmem:[%s6196_s1 + $0x3a4] ss:$16 sps:$4 sm:$0xff]   ;;  %v4155_v43 = vld [vmem:[%s6196_s1 + $0x3a0] ss:$16 sps:$4 sm:$0xff]  }
  0x17   :  { %1281 = vmatpush1.bf16.msra.mxu0 %v4124_v22  ;;  %v4156_v44 = vld [vmem:[%s6196_s1 + $0x184] ss:$16 sps:$4 sm:$0xff]   ;;  %v4160_v49 = vld [vmem:[%s6196_s1 + $0x180] ss:$16 sps:$4 sm:$0xff]   ;;  %v4214_v22 = vld [vmem:[%s6196_s1 + $0xac] ss:$16 sps:$4 sm:$0xff]  }
  0x18   :  { %1322 = vmatpush1.bf16.msra.mxu1 %v4125_v23  ;;  %1282 = vmatprep.subr.bf16.mxu0 %v4126_v24  ;;  %v4158_v45 = vld [vmem:[%s6196_s1 + $0x384] ss:$16 sps:$4 sm:$0xff]   ;;  %v4161_v50 = vld [vmem:[%s6196_s1 + $0x380] ss:$16 sps:$4 sm:$0xff]   ;;  %v4212_v24 = vld [vmem:[%s6196_s1 + $0xa8] ss:$16 sps:$4 sm:$0xff]  }
  0x19   :  { %1323 = vmatprep.subr.bf16.mxu1 %v4128_v25  ;;  %v40_v46 = vld [vmem:[%s6195_s0] sm:$0xff] }
  0x1a   :  { %v4957_v47 = vcombine.high %v40_v46, %v40_v46  ;;  %v4162_v52 = vld [vmem:[%s6196_s1 + $0x164] ss:$16 sps:$4 sm:$0xff]   ;;  %v4166_v54 = vld [vmem:[%s6196_s1 + $0x160] ss:$16 sps:$4 sm:$0xff]   ;;  %v5026_v6 = vcombine.low %v40_v46, %v40_v46  ;;  %v4242_v46 = vld [vmem:[%s6196_s1 + $0x8] ss:$16 sps:$4 sm:$0xff]  }
  0x1b   :  { %1283 = vmatpush1.bf16.msra.mxu0 %v4130_v26  ;;  %v4164_v53 = vld [vmem:[%s6196_s1 + $0x364] ss:$16 sps:$4 sm:$0xff]   ;;  %v4167_v55 = vld [vmem:[%s6196_s1 + $0x360] ss:$16 sps:$4 sm:$0xff]   ;;  %v4220_v26 = vld [vmem:[%s6196_s1 + $0x8c] ss:$16 sps:$4 sm:$0xff]  }
  0x1c   :  { %1324 = vmatpush1.bf16.msra.mxu1 %v4131_v27  ;;  %1284 = vmatprep.subr.bf16.mxu0 %v4132_v28  ;;  %v4168_v56 = vld [vmem:[%s6196_s1 + $0x144] ss:$16 sps:$4 sm:$0xff]   ;;  %v4172_v58 = vld [vmem:[%s6196_s1 + $0x140] ss:$16 sps:$4 sm:$0xff]   ;;  %v4218_v28 = vld [vmem:[%s6196_s1 + $0x88] ss:$16 sps:$4 sm:$0xff]  }
  0x1d   :  { %1325 = vmatprep.subr.bf16.mxu1 %v4134_v29  ;;  %1302 = vmatprep.mubr.bf16.mxu0 %v4957_v47  ;;  %v4170_v57 = vld [vmem:[%s6196_s1 + $0x344] ss:$16 sps:$4 sm:$0xff]   ;;  %v4173_v59 = vld [vmem:[%s6196_s1 + $0x340] ss:$16 sps:$4 sm:$0xff]  }
  0x1e   :  { %v4174_v60 = vld [vmem:[%s6196_s1 + $0x124] ss:$16 sps:$4 sm:$0xff]   ;;  %v4178_v62 = vld [vmem:[%s6196_s1 + $0x120] ss:$16 sps:$4 sm:$0xff]  }
  0x1f   :  { %1285 = vmatpush1.bf16.msra.mxu0 %v4136_v30  ;;  %v4176_v61 = vld [vmem:[%s6196_s1 + $0x324] ss:$16 sps:$4 sm:$0xff]   ;;  %v4179_v63 = vld [vmem:[%s6196_s1 + $0x320] ss:$16 sps:$4 sm:$0xff]   ;;  %v4226_v30 = vld [vmem:[%s6196_s1 + $0x6c] ss:$16 sps:$4 sm:$0xff]  }
  0x20   :  { %1326 = vmatpush1.bf16.msra.mxu1 %v4137_v31  ;;  %1286 = vmatprep.subr.bf16.mxu0 %v4138_v32  ;;  %v4180_v0 = vld [vmem:[%s6196_s1 + $0x104] ss:$16 sps:$4 sm:$0xff]   ;;  %v4184_v2 = vld [vmem:[%s6196_s1 + $0x100] ss:$16 sps:$4 sm:$0xff]  }
  0x21   :  { %1327 = vmatprep.subr.bf16.mxu1 %v4140_v33  ;;  %v4182_v1 = vld [vmem:[%s6196_s1 + $0x304] ss:$16 sps:$4 sm:$0xff]   ;;  %v4185_v3 = vld [vmem:[%s6196_s1 + $0x300] ss:$16 sps:$4 sm:$0xff]  }
  0x22   :  { %v4192_v4 = vld [vmem:[%s6196_s1 + $0x4e4] ss:$16 sps:$4 sm:$0xff]   ;;  %v4190_v8 = vld [vmem:[%s6196_s1 + $0x4e0] ss:$16 sps:$4 sm:$0xff]  }
  0x23   :  { %1287 = vmatpush2.bf16.msra.mxu0 %v4142_v34  ;;  %v4195_v5 = vld [vmem:[%s6196_s1 + $0x604] ss:$16 sps:$4 sm:$0xff]   ;;  %v4193_v9 = vld [vmem:[%s6196_s1 + $0x600] ss:$16 sps:$4 sm:$0xff]   ;;  %v4224_v34 = vld [vmem:[%s6196_s1 + $0x68] ss:$16 sps:$4 sm:$0xff]  }
  0x24   :  { %1328 = vmatpush2.bf16.msra.mxu1 %v4143_v35  ;;  %1288 = vmatprep.subr.bf16.mxu0 %v4144_v36  ;;  %v4198_v10 = vld [vmem:[%s6196_s1 + $0x4c4] ss:$16 sps:$4 sm:$0xff]   ;;  %v4196_v12 = vld [vmem:[%s6196_s1 + $0x4c0] ss:$16 sps:$4 sm:$0xff]   ;;  %v4232_v36 = vld [vmem:[%s6196_s1 + $0x4c] ss:$16 sps:$4 sm:$0xff]  }
  0x25   :  { %1329 = vmatprep.subr.bf16.mxu1 %v4146_v37  ;;  %v4204_v14 = vld [vmem:[%s6196_s1 + $0x4a4] ss:$16 sps:$4 sm:$0xff]   ;;  %v4202_v16 = vld [vmem:[%s6196_s1 + $0x4a0] ss:$16 sps:$4 sm:$0xff]  }
  0x26   :  { %v4211_v19 = vld [vmem:[%s6196_s1 + $0x484] ss:$16 sps:$4 sm:$0xff]   ;;  %v4209_v21 = vld [vmem:[%s6196_s1 + $0x480] ss:$16 sps:$4 sm:$0xff]  }
  0x27   :  { %1289 = vmatpush2.bf16.msra.mxu0 %v4148_v38  ;;  %v4217_v23 = vld [vmem:[%s6196_s1 + $0x464] ss:$16 sps:$4 sm:$0xff]   ;;  %v4215_v25 = vld [vmem:[%s6196_s1 + $0x460] ss:$16 sps:$4 sm:$0xff]   ;;  %v4230_v38 = vld [vmem:[%s6196_s1 + $0x48] ss:$16 sps:$4 sm:$0xff]  }
  0x28   :  { %1330 = vmatpush2.bf16.msra.mxu1 %v4149_v39  ;;  %1290 = vmatprep.subr.bf16.mxu0 %v4150_v40  ;;  %v4223_v27 = vld [vmem:[%s6196_s1 + $0x444] ss:$16 sps:$4 sm:$0xff]   ;;  %v4221_v29 = vld [vmem:[%s6196_s1 + $0x440] ss:$16 sps:$4 sm:$0xff]   ;;  %v4238_v40 = vld [vmem:[%s6196_s1 + $0x2c] ss:$16 sps:$4 sm:$0xff]  }
  0x29   :  { %1331 = vmatprep.subr.bf16.mxu1 %v4152_v41  ;;  %v4229_v31 = vld [vmem:[%s6196_s1 + $0x424] ss:$16 sps:$4 sm:$0xff]   ;;  %v4227_v35 = vld [vmem:[%s6196_s1 + $0x420] ss:$16 sps:$4 sm:$0xff]  }
  0x2a   :  { %v5107_v32 = vld [vmem:[%s6195_s0 + $0x10] sm:$0xff] }
  0x2b   :  { %1291 = vmatpush2.bf16.msra.mxu0 %v4154_v42  ;;  %v5111_v33 = vcombine.high %v5107_v32, %v5107_v32  ;;  %v4235_v37 = vld [vmem:[%s6196_s1 + $0x404] ss:$16 sps:$4 sm:$0xff]   ;;  %v4233_v39 = vld [vmem:[%s6196_s1 + $0x400] ss:$16 sps:$4 sm:$0xff]   ;;  %v4236_v42 = vld [vmem:[%s6196_s1 + $0x28] ss:$16 sps:$4 sm:$0xff]  }
  0x2c   :  { %1332 = vmatpush2.bf16.msra.mxu1 %v4155_v43  ;;  %1292 = vmatprep.subr.bf16.mxu0 %v4156_v44  ;;  %v4241_v41 = vld [vmem:[%s6196_s1 + $0x5e4] ss:$16 sps:$4 sm:$0xff]   ;;  %v4239_v43 = vld [vmem:[%s6196_s1 + $0x5e0] ss:$16 sps:$4 sm:$0xff]   ;;  %v4244_v44 = vld [vmem:[%s6196_s1 + $0xc] ss:$16 sps:$4 sm:$0xff]  }
  0x2d   :  { %1333 = vmatprep.subr.bf16.mxu1 %v4158_v45  ;;  %v4247_v45 = vld [vmem:[%s6196_s1 + $0x5c4] ss:$16 sps:$4 sm:$0xff]  }
  0x2f   :  { %1293 = vmatpush2.bf16.msra.mxu0 %v4160_v49  ;;  %v4253_v49 = vld [vmem:[%s6196_s1 + $0x5a4] ss:$16 sps:$4 sm:$0xff]  }
  0x30   :  { %1334 = vmatpush2.bf16.msra.mxu1 %v4161_v50  ;;  %1294 = vmatprep.subr.bf16.mxu0 %v4162_v52  ;;  %v4248_v50 = vld [vmem:[%s6196_s1 + $0x1e8] ss:$16 sps:$4 sm:$0xff]   ;;  %v4251_v52 = vld [vmem:[%s6196_s1 + $0x5a0] ss:$16 sps:$4 sm:$0xff]  }
  0x31   :  { %1335 = vmatprep.subr.bf16.mxu1 %v4164_v53  ;;  %v4256_v53 = vld [vmem:[%s6196_s1 + $0x1cc] ss:$16 sps:$4 sm:$0xff]  }
  0x33   :  { %1295 = vmatpush2.bf16.msra.mxu0 %v4166_v54  ;;  %v4259_v54 = vld [vmem:[%s6196_s1 + $0x584] ss:$16 sps:$4 sm:$0xff]  }
  0x34   :  { %1336 = vmatpush2.bf16.msra.mxu1 %v4167_v55  ;;  %1296 = vmatprep.subr.bf16.mxu0 %v4168_v56  ;;  %v4254_v55 = vld [vmem:[%s6196_s1 + $0x1c8] ss:$16 sps:$4 sm:$0xff]   ;;  %v4257_v56 = vld [vmem:[%s6196_s1 + $0x580] ss:$16 sps:$4 sm:$0xff]  }
  0x35   :  { %1337 = vmatprep.subr.bf16.mxu1 %v4170_v57  ;;  %v4262_v57 = vld [vmem:[%s6196_s1 + $0x1ac] ss:$16 sps:$4 sm:$0xff]  }
  0x37   :  { %1297 = vmatpush2.bf16.msra.mxu0 %v4172_v58  ;;  %v4265_v58 = vld [vmem:[%s6196_s1 + $0x564] ss:$16 sps:$4 sm:$0xff]  }
  0x38   :  { %1338 = vmatpush2.bf16.msra.mxu1 %v4173_v59  ;;  %1298 = vmatprep.subr.bf16.mxu0 %v4174_v60  ;;  %v4260_v59 = vld [vmem:[%s6196_s1 + $0x1a8] ss:$16 sps:$4 sm:$0xff]   ;;  %v4263_v60 = vld [vmem:[%s6196_s1 + $0x560] ss:$16 sps:$4 sm:$0xff]  }
  0x39   :  { %1339 = vmatprep.subr.bf16.mxu1 %v4176_v61  ;;  %v4268_v61 = vld [vmem:[%s6196_s1 + $0x18c] ss:$16 sps:$4 sm:$0xff]  }
  0x3b   :  { %1299 = vmatpush2.bf16.msra.mxu0 %v4178_v62  ;;  %v4271_v62 = vld [vmem:[%s6196_s1 + $0x544] ss:$16 sps:$4 sm:$0xff]  }
  0x3c   :  { %1340 = vmatpush2.bf16.msra.mxu1 %v4179_v63  ;;  %1300 = vmatprep.subr.bf16.mxu0 %v4180_v0  ;;  %v4266_v63 = vld [vmem:[%s6196_s1 + $0x188] ss:$16 sps:$4 sm:$0xff]   ;;  %v4269_v0 = vld [vmem:[%s6196_s1 + $0x540] ss:$16 sps:$4 sm:$0xff]  }
  0x3d   :  { %1341 = vmatprep.subr.bf16.mxu1 %v4182_v1  ;;  %v4274_v1 = vld [vmem:[%s6196_s1 + $0x16c] ss:$16 sps:$4 sm:$0xff]  }
  0x3f   :  { %1301 = vmatpush2.bf16.msra.mxu0 %v4184_v2  ;;  %v4277_v2 = vld [vmem:[%s6196_s1 + $0x524] ss:$16 sps:$4 sm:$0xff]  }
  0x40   :  { %1342 = vmatpush2.bf16.msra.mxu1 %v4185_v3  ;;  %1352 = vmatprep.subr.bf16.mxu0 %v4192_v4  ;;  %v4272_v3 = vld [vmem:[%s6196_s1 + $0x168] ss:$16 sps:$4 sm:$0xff]   ;;  %v4275_v4 = vld [vmem:[%s6196_s1 + $0x520] ss:$16 sps:$4 sm:$0xff]  }
  0x41   :  { %1407 = vmatprep.subr.bf16.mxu1 %v4195_v5  ;;  %v4280_v5 = vld [vmem:[%s6196_s1 + $0x14c] ss:$16 sps:$4 sm:$0xff]  }
  0x42   :  { %1303 = vmatmul.mubr.bf16.vlgmr.msra.gmra.mxu0 %v5026_v6 }
  0x43   :  { %1344 = vmatmul.mubr.bf16.vlgmr.msra.gmra.mxu1 %v5028_v7  ;;  %1353 = vmatpush1.bf16.msra.mxu0 %v4190_v8  ;;  %v4283_v8 = vld [vmem:[%s6196_s1 + $0x504] ss:$16 sps:$4 sm:$0xff]  }
  0x44   :  { %1408 = vmatpush1.bf16.msra.mxu1 %v4193_v9  ;;  %1354 = vmatprep.subr.bf16.mxu0 %v4198_v10  ;;  %v4278_v9 = vld [vmem:[%s6196_s1 + $0x148] ss:$16 sps:$4 sm:$0xff]   ;;  %v4281_v10 = vld [vmem:[%s6196_s1 + $0x500] ss:$16 sps:$4 sm:$0xff]  }
  0x45   :  { %1425 = vmatprep.mubr.bf16.mxu1 %v4751_v13  ;;  %1434 = vmatprep.subr.bf16.mxu1 %v4201_v11  ;;  %v4288_v11 = vld [vmem:[%s6196_s1 + $0x12c] ss:$16 sps:$4 sm:$0xff]  }
  0x46   :  { %1384 = vmatprep.mubr.bf16.mxu0 %v5111_v33 }
  0x47   :  { %1355 = vmatpush1.bf16.msra.mxu0 %v4196_v12  ;;  %v4291_v12 = vld [vmem:[%s6196_s1 + $0x2ec] ss:$16 sps:$4 sm:$0xff]  }
  0x48   :  { %1356 = vmatprep.subr.bf16.mxu0 %v4204_v14  ;;  %v5236_v14 = vcombine.low %v5107_v32, %v5107_v32  ;;  %v4321_v32 = vld [vmem:[%s6196_s1 + $0x24c] ss:$16 sps:$4 sm:$0xff]  }
  0x4b   :  { %3821 = vmatmul.mubr.msk.bf16.vlgmr.msra.gmra.mxu1 %vm1266_vm0, %v4205_v17  ;;  %1357 = vmatpush1.bf16.msra.mxu0 %v4202_v16  ;;  %v4289_v16 = vld [vmem:[%s6196_s1 + $0x2e8] ss:$16 sps:$4 sm:$0xff]   ;;  %v4294_v17 = vld [vmem:[%s6196_s1 + $0x10c] ss:$16 sps:$4 sm:$0xff]  }
  0x4c   :  { %1435 = vmatpush1.bf16.msra.mxu1 %v4199_v15  ;;  %1358 = vmatprep.subr.bf16.mxu0 %v4211_v19  ;;  %v4286_v15 = vld [vmem:[%s6196_s1 + $0x128] ss:$16 sps:$4 sm:$0xff]  }
  0x4d   :  { %1436 = vmatprep.subr.bf16.mxu1 %v4208_v18  ;;  %1466 = vmatprep.mubr.bf16.mxu1 %v4957_v47  ;;  %v4245_v47 = vld [vmem:[%s6196_s1 + $0x5c0] ss:$16 sps:$4 sm:$0xff]   ;;  %v4297_v18 = vld [vmem:[%s6196_s1 + $0x2cc] ss:$16 sps:$4 sm:$0xff]   ;;  %v4292_v19 = vld [vmem:[%s6196_s1 + $0x108] ss:$16 sps:$4 sm:$0xff]  }
  0x4f   :  { %1359 = vmatpush1.bf16.msra.mxu0 %v4209_v21  ;;  %v4300_v21 = vld [vmem:[%s6196_s1 + $0x4ec] ss:$16 sps:$4 sm:$0xff]  }
  0x50   :  { %1437 = vmatpush1.bf16.msra.mxu1 %v4206_v20  ;;  %1360 = vmatprep.subr.bf16.mxu0 %v4217_v23  ;;  %v4295_v20 = vld [vmem:[%s6196_s1 + $0x2c8] ss:$16 sps:$4 sm:$0xff]  }
  0x51   :  { %1438 = vmatprep.subr.bf16.mxu1 %v4214_v22  ;;  %v4303_v22 = vld [vmem:[%s6196_s1 + $0x2ac] ss:$16 sps:$4 sm:$0xff]   ;;  %v4298_v23 = vld [vmem:[%s6196_s1 + $0x4e8] ss:$16 sps:$4 sm:$0xff]  }
  0x53   :  { %1361 = vmatpush1.bf16.msra.mxu0 %v4215_v25  ;;  %v4306_v25 = vld [vmem:[%s6196_s1 + $0x4cc] ss:$16 sps:$4 sm:$0xff]  }
  0x54   :  { %1439 = vmatpush1.bf16.msra.mxu1 %v4212_v24  ;;  %1362 = vmatprep.subr.bf16.mxu0 %v4223_v27  ;;  %v4301_v24 = vld [vmem:[%s6196_s1 + $0x2a8] ss:$16 sps:$4 sm:$0xff]  }
  0x55   :  { %1440 = vmatprep.subr.bf16.mxu1 %v4220_v26  ;;  %v4309_v26 = vld [vmem:[%s6196_s1 + $0x28c] ss:$16 sps:$4 sm:$0xff]   ;;  %v4304_v27 = vld [vmem:[%s6196_s1 + $0x4c8] ss:$16 sps:$4 sm:$0xff]  }
  0x57   :  { %1363 = vmatpush1.bf16.msra.mxu0 %v4221_v29  ;;  %v4315_v29 = vld [vmem:[%s6196_s1 + $0x26c] ss:$16 sps:$4 sm:$0xff]  }
  0x58   :  { %1441 = vmatpush1.bf16.msra.mxu1 %v4218_v28  ;;  %1364 = vmatprep.subr.bf16.mxu0 %v4229_v31  ;;  %v4312_v28 = vld [vmem:[%s6196_s1 + $0x4ac] ss:$16 sps:$4 sm:$0xff]  }
  0x59   :  { %1442 = vmatprep.subr.bf16.mxu1 %v4226_v30  ;;  %v4310_v30 = vld [vmem:[%s6196_s1 + $0x4a8] ss:$16 sps:$4 sm:$0xff]   ;;  %v4318_v31 = vld [vmem:[%s6196_s1 + $0x48c] ss:$16 sps:$4 sm:$0xff]  }
  0x5b   :  { %1365 = vmatpush1.bf16.msra.mxu0 %v4227_v35  ;;  %v4324_v35 = vld [vmem:[%s6196_s1 + $0x46c] ss:$16 sps:$4 sm:$0xff]  }
  0x5c   :  { %1443 = vmatpush1.bf16.msra.mxu1 %v4224_v34  ;;  %1366 = vmatprep.subr.bf16.mxu0 %v4235_v37  ;;  %v4316_v34 = vld [vmem:[%s6196_s1 + $0x488] ss:$16 sps:$4 sm:$0xff]  }
  0x5d   :  { %1444 = vmatprep.subr.bf16.mxu1 %v4232_v36  ;;  %v4327_v36 = vld [vmem:[%s6196_s1 + $0x22c] ss:$16 sps:$4 sm:$0xff]   ;;  %v4322_v37 = vld [vmem:[%s6196_s1 + $0x468] ss:$16 sps:$4 sm:$0xff]  }
  0x5f   :  { %1367 = vmatpush1.bf16.msra.mxu0 %v4233_v39  ;;  %v4330_v39 = vld [vmem:[%s6196_s1 + $0x44c] ss:$16 sps:$4 sm:$0xff]  }
  0x60   :  { %1445 = vmatpush1.bf16.msra.mxu1 %v4230_v38  ;;  %1368 = vmatprep.subr.bf16.mxu0 %v4241_v41  ;;  %v4325_v38 = vld [vmem:[%s6196_s1 + $0x228] ss:$16 sps:$4 sm:$0xff]  }
  0x61   :  { %1446 = vmatprep.subr.bf16.mxu1 %v4238_v40  ;;  %v4333_v40 = vld [vmem:[%s6196_s1 + $0x20c] ss:$16 sps:$4 sm:$0xff]   ;;  %v4328_v41 = vld [vmem:[%s6196_s1 + $0x448] ss:$16 sps:$4 sm:$0xff]  }
  0x63   :  { %1369 = vmatpush2.bf16.msra.mxu0 %v4239_v43  ;;  %v4336_v43 = vld [vmem:[%s6196_s1 + $0x42c] ss:$16 sps:$4 sm:$0xff]  }
  0x64   :  { %1447 = vmatpush1.bf16.msra.mxu1 %v4236_v42  ;;  %1370 = vmatprep.subr.bf16.mxu0 %v4247_v45  ;;  %v4331_v42 = vld [vmem:[%s6196_s1 + $0x208] ss:$16 sps:$4 sm:$0xff]  }
  0x65   :  { %1448 = vmatprep.subr.bf16.mxu1 %v4244_v44  ;;  %v4339_v44 = vld [vmem:[%s6196_s1 + $0x3ec] ss:$16 sps:$4 sm:$0xff]   ;;  %v4334_v45 = vld [vmem:[%s6196_s1 + $0x428] ss:$16 sps:$4 sm:$0xff]  }
  0x67   :  { %1371 = vmatpush2.bf16.msra.mxu0 %v4245_v47  ;;  %v4342_v47 = vld [vmem:[%s6196_s1 + $0x40c] ss:$16 sps:$4 sm:$0xff]  }
  0x68   :  { %1449 = vmatpush1.bf16.msra.mxu1 %v4242_v46  ;;  %1372 = vmatprep.subr.bf16.mxu0 %v4253_v49  ;;  %v4337_v46 = vld [vmem:[%s6196_s1 + $0x3e8] ss:$16 sps:$4 sm:$0xff]  }
  0x69   :  { %1450 = vmatprep.subr.bf16.mxu1 %v4250_v48  ;;  %v4345_v48 = vld [vmem:[%s6196_s1 + $0x3cc] ss:$16 sps:$4 sm:$0xff]   ;;  %v4340_v49 = vld [vmem:[%s6196_s1 + $0x408] ss:$16 sps:$4 sm:$0xff]  }
  0x6b   :  { %1373 = vmatpush2.bf16.msra.mxu0 %v4251_v52  ;;  %v4348_v52 = vld [vmem:[%s6196_s1 + $0x5ec] ss:$16 sps:$4 sm:$0xff]  }
  0x6c   :  { %1451 = vmatpush2.bf16.msra.mxu1 %v4248_v50  ;;  %1374 = vmatprep.subr.bf16.mxu0 %v4259_v54  ;;  %v4343_v50 = vld [vmem:[%s6196_s1 + $0x3c8] ss:$16 sps:$4 sm:$0xff]  }
  0x6d   :  { %1452 = vmatprep.subr.bf16.mxu1 %v4256_v53  ;;  %v4351_v53 = vld [vmem:[%s6196_s1 + $0x3ac] ss:$16 sps:$4 sm:$0xff]   ;;  %v4346_v54 = vld [vmem:[%s6196_s1 + $0x5e8] ss:$16 sps:$4 sm:$0xff]  }
  0x6f   :  { %1375 = vmatpush2.bf16.msra.mxu0 %v4257_v56  ;;  %v4354_v56 = vld [vmem:[%s6196_s1 + $0x5cc] ss:$16 sps:$4 sm:$0xff]  }
  0x70   :  { %1453 = vmatpush2.bf16.msra.mxu1 %v4254_v55  ;;  %1376 = vmatprep.subr.bf16.mxu0 %v4265_v58  ;;  %v4349_v55 = vld [vmem:[%s6196_s1 + $0x3a8] ss:$16 sps:$4 sm:$0xff]  }
  0x71   :  { %1454 = vmatprep.subr.bf16.mxu1 %v4262_v57  ;;  %v4357_v57 = vld [vmem:[%s6196_s1 + $0x38c] ss:$16 sps:$4 sm:$0xff]   ;;  %v4352_v58 = vld [vmem:[%s6196_s1 + $0x5c8] ss:$16 sps:$4 sm:$0xff]  }
  0x73   :  { %1377 = vmatpush2.bf16.msra.mxu0 %v4263_v60  ;;  %v4360_v60 = vld [vmem:[%s6196_s1 + $0x5ac] ss:$16 sps:$4 sm:$0xff]  }
  0x74   :  { %1455 = vmatpush2.bf16.msra.mxu1 %v4260_v59  ;;  %1378 = vmatprep.subr.bf16.mxu0 %v4271_v62  ;;  %v4355_v59 = vld [vmem:[%s6196_s1 + $0x388] ss:$16 sps:$4 sm:$0xff]  }
  0x75   :  { %1456 = vmatprep.subr.bf16.mxu1 %v4268_v61  ;;  %v4363_v61 = vld [vmem:[%s6196_s1 + $0x36c] ss:$16 sps:$4 sm:$0xff]   ;;  %v4358_v62 = vld [vmem:[%s6196_s1 + $0x5a8] ss:$16 sps:$4 sm:$0xff]  }
  0x77   :  { %1379 = vmatpush2.bf16.msra.mxu0 %v4269_v0  ;;  %v4366_v0 = vld [vmem:[%s6196_s1 + $0x58c] ss:$16 sps:$4 sm:$0xff]  }
  0x78   :  { %1457 = vmatpush2.bf16.msra.mxu1 %v4266_v63  ;;  %1380 = vmatprep.subr.bf16.mxu0 %v4277_v2  ;;  %v4361_v63 = vld [vmem:[%s6196_s1 + $0x368] ss:$16 sps:$4 sm:$0xff]  }
  0x79   :  { %1458 = vmatprep.subr.bf16.mxu1 %v4274_v1  ;;  %v4369_v1 = vld [vmem:[%s6196_s1 + $0x34c] ss:$16 sps:$4 sm:$0xff]   ;;  %v4364_v2 = vld [vmem:[%s6196_s1 + $0x588] ss:$16 sps:$4 sm:$0xff]  }
  0x7b   :  { %1381 = vmatpush2.bf16.msra.mxu0 %v4275_v4  ;;  %v4372_v4 = vld [vmem:[%s6196_s1 + $0x56c] ss:$16 sps:$4 sm:$0xff]  }
  0x7c   :  { %1459 = vmatpush2.bf16.msra.mxu1 %v4272_v3  ;;  %1382 = vmatprep.subr.bf16.mxu0 %v4283_v8  ;;  %v4367_v3 = vld [vmem:[%s6196_s1 + $0x348] ss:$16 sps:$4 sm:$0xff]  }
  0x7d   :  { %1460 = vmatprep.subr.bf16.mxu1 %v4280_v5  ;;  %v4375_v5 = vld [vmem:[%s6196_s1 + $0x32c] ss:$16 sps:$4 sm:$0xff]   ;;  %v4370_v8 = vld [vmem:[%s6196_s1 + $0x568] ss:$16 sps:$4 sm:$0xff]  }
  0x7f   :  { %1383 = vmatpush2.bf16.msra.mxu0 %v4281_v10  ;;  %v4378_v10 = vld [vmem:[%s6196_s1 + $0x54c] ss:$16 sps:$4 sm:$0xff]  }
  0x80   :  { %1461 = vmatpush2.bf16.msra.mxu1 %v4278_v9  ;;  %1475 = vmatprep.subr.bf16.mxu0 %v4291_v12  ;;  %v4373_v9 = vld [vmem:[%s6196_s1 + $0x328] ss:$16 sps:$4 sm:$0xff]  }
  0x81   :  { %1462 = vmatprep.subr.bf16.mxu1 %v4288_v11  ;;  %v4381_v11 = vld [vmem:[%s6196_s1 + $0x30c] ss:$16 sps:$4 sm:$0xff]   ;;  %v4376_v12 = vld [vmem:[%s6196_s1 + $0x548] ss:$16 sps:$4 sm:$0xff]  }
  0x82   :  { %1385 = vmatmul.mubr.bf16.vlgmr.msra.gmra.mxu0 %v5236_v14 }
  0x83   :  { %1476 = vmatpush1.bf16.msra.mxu0 %v4289_v16  ;;  %1507 = vmatprep.mubr.bf16.mxu0 %v4968_v51  ;;  %v4307_v51 = vld [vmem:[%s6196_s1 + $0x288] ss:$16 sps:$4 sm:$0xff]   ;;  %v4384_v16 = vld [vmem:[%s6196_s1 + $0x52c] ss:$16 sps:$4 sm:$0xff]  }
  0x84   :  { %1463 = vmatpush2.bf16.msra.mxu1 %v4286_v15  ;;  %1477 = vmatprep.subr.bf16.mxu0 %v4297_v18  ;;  %v4379_v15 = vld [vmem:[%s6196_s1 + $0x308] ss:$16 sps:$4 sm:$0xff]  }
  0x85   :  { %1464 = vmatprep.subr.bf16.mxu1 %v4294_v17  ;;  %v4391_v17 = vld [vmem:[%s6198_s3 + $0x78] sm:$0xff]  }
  0x86   :  { %v4382_v18 = vld [vmem:[%s6196_s1 + $0x528] ss:$16 sps:$4 sm:$0xff]  }
  0x87   :  { %1478 = vmatpush1.bf16.msra.mxu0 %v4295_v20  ;;  %v4387_v20 = vld [vmem:[%s6196_s1 + $0x50c] ss:$16 sps:$4 sm:$0xff]  }
  0x88   :  { %1465 = vmatpush2.bf16.msra.mxu1 %v4292_v19  ;;  %1479 = vmatprep.subr.bf16.mxu0 %v4303_v22  ;;  %v4392_v19 = vld [vmem:[%s6198_s3 + $0x38] sm:$0xff]  }
  0x89   :  { %1516 = vmatprep.subr.bf16.mxu1 %v4300_v21  ;;  %v4393_v21 = vld [vmem:[%s6198_s3 + $0x70] sm:$0xff]   ;;  %v4385_v22 = vld [vmem:[%s6196_s1 + $0x508] ss:$16 sps:$4 sm:$0xff]  }
  0x8b   :  { %1467 = vmatmul.mubr.bf16.vlgmr.msra.gmra.mxu1 %v5026_v6  ;;  %1480 = vmatpush1.bf16.msra.mxu0 %v4301_v24  ;;  %v4313_v6 = vld [vmem:[%s6196_s1 + $0x268] ss:$16 sps:$4 sm:$0xff]   ;;  %v4394_v24 = vld [vmem:[%s6198_s3 + $0x30] sm:$0xff]  }
  0x8c   :  { %1517 = vmatpush1.bf16.msra.mxu1 %v4298_v23  ;;  %1481 = vmatprep.subr.bf16.mxu0 %v4309_v26  ;;  %v4390_v23 = vld [vmem:[%s6196_s1 + $0x60c] ss:$16 sps:$4 sm:$0xff]  }
  0x8d   :  { %1518 = vmatprep.subr.bf16.mxu1 %v4306_v25  ;;  %1548 = vmatprep.mubr.bf16.mxu1 %v5111_v33  ;;  %v4319_v33 = vld [vmem:[%s6196_s1 + $0x248] ss:$16 sps:$4 sm:$0xff]  }
  0x8e   :  { %v4395_v25 = vld [vmem:[%s6198_s3 + $0x68] sm:$0xff]  }
  0x8f   :  { %1482 = vmatpush1.bf16.msra.mxu0 %v4307_v51  ;;  %v4396_v26 = vld [vmem:[%s6198_s3 + $0x28] sm:$0xff]   ;;  %v4398_v51 = vld [vmem:[%s6198_s3 + $0x20] sm:$0xff]  }
  0x90   :  { %1519 = vmatpush1.bf16.msra.mxu1 %v4304_v27  ;;  %1483 = vmatprep.subr.bf16.mxu0 %v4315_v29  ;;  %v4397_v27 = vld [vmem:[%s6198_s3 + $0x60] sm:$0xff]   ;;  %v4400_v29 = vld [vmem:[%s6198_s3 + $0x18] sm:$0xff]  }
  0x91   :  { %1520 = vmatprep.subr.bf16.mxu1 %v4312_v28  ;;  %v4399_v28 = vld [vmem:[%s6198_s3 + $0x58] sm:$0xff]  }
  0x93   :  { %1484 = vmatpush1.bf16.msra.mxu0 %v4313_v6  ;;  %v4408_v6 = vld [vmem:[%s6198_s3 + $0xb0] sm:$0xff]  }
  0x94   :  { %1521 = vmatpush1.bf16.msra.mxu1 %v4310_v30  ;;  %1485 = vmatprep.subr.bf16.mxu0 %v4321_v32  ;;  %v4407_v30 = vld [vmem:[%s6198_s3 + $0xb8] sm:$0xff]   ;;  %v4402_v32 = vld [vmem:[%s6198_s3 + $0x10] sm:$0xff]  }
  0x95   :  { %1522 = vmatprep.subr.bf16.mxu1 %v4318_v31  ;;  %v4706_v31 = vld [vmem:[%s6195_s0 + $0x18] ss:$0 sps:$4 sm:$0xff]  }
  0x97   :  { %1486 = vmatpush1.bf16.msra.mxu0 %v4319_v33  ;;  %v4404_v33 = vld [vmem:[%s6198_s3 + $0x8] sm:$0xff]  }
  0x98   :  { %1523 = vmatpush1.bf16.msra.mxu1 %v4316_v34  ;;  %1487 = vmatprep.subr.bf16.mxu0 %v4327_v36  ;;  %v4403_v34 = vld [vmem:[%s6198_s3 + $0x48] sm:$0xff]   ;;  %v4406_v36 = vld [vmem:[%s6198_s3] sm:$0xff]  }
  0x99   :  { %1524 = vmatprep.subr.bf16.mxu1 %v4324_v35  ;;  %v4405_v35 = vld [vmem:[%s6198_s3 + $0x40] sm:$0xff]  }
  0x9b   :  { %1488 = vmatpush1.bf16.msra.mxu0 %v4325_v38 }
  0x9c   :  { %1525 = vmatpush1.bf16.msra.mxu1 %v4322_v37  ;;  %1489 = vmatprep.subr.bf16.mxu0 %v4333_v40 }
  0x9d   :  { %1526 = vmatprep.subr.bf16.mxu1 %v4330_v39 }
  0x9f   :  { %1490 = vmatpush1.bf16.msra.mxu0 %v4331_v42 }
  0xa0   :  { %1527 = vmatpush1.bf16.msra.mxu1 %v4328_v41  ;;  %1491 = vmatprep.subr.bf16.mxu0 %v4339_v44 }
  0xa1   :  { %1528 = vmatprep.subr.bf16.mxu1 %v4336_v43 }
  0xa3   :  { %1492 = vmatpush2.bf16.msra.mxu0 %v4337_v46 }
  0xa4   :  { %1529 = vmatpush1.bf16.msra.mxu1 %v4334_v45  ;;  %1493 = vmatprep.subr.bf16.mxu0 %v4345_v48 }
  0xa5   :  { %1530 = vmatprep.subr.bf16.mxu1 %v4342_v47 }
  0xa7   :  { %1494 = vmatpush2.bf16.msra.mxu0 %v4343_v50 }
  0xa8   :  { %1531 = vmatpush1.bf16.msra.mxu1 %v4340_v49  ;;  %1495 = vmatprep.subr.bf16.mxu0 %v4351_v53 }
  0xa9   :  { %1532 = vmatprep.subr.bf16.mxu1 %v4348_v52 }
  0xab   :  { %1496 = vmatpush2.bf16.msra.mxu0 %v4349_v55 }
  0xac   :  { %1533 = vmatpush2.bf16.msra.mxu1 %v4346_v54  ;;  %1497 = vmatprep.subr.bf16.mxu0 %v4357_v57 }
  0xad   :  { %1534 = vmatprep.subr.bf16.mxu1 %v4354_v56 }
  0xaf   :  { %1498 = vmatpush2.bf16.msra.mxu0 %v4355_v59 }
  0xb0   :  { %1535 = vmatpush2.bf16.msra.mxu1 %v4352_v58  ;;  %1499 = vmatprep.subr.bf16.mxu0 %v4363_v61 }
  0xb1   :  { %1536 = vmatprep.subr.bf16.mxu1 %v4360_v60 }
  0xb3   :  { %1500 = vmatpush2.bf16.msra.mxu0 %v4361_v63 }
  0xb4   :  { %1537 = vmatpush2.bf16.msra.mxu1 %v4358_v62  ;;  %1501 = vmatprep.subr.bf16.mxu0 %v4369_v1 }
  0xb5   :  { %1538 = vmatprep.subr.bf16.mxu1 %v4366_v0 }
  0xb7   :  { %1502 = vmatpush2.bf16.msra.mxu0 %v4367_v3 }
  0xb8   :  { %1539 = vmatpush2.bf16.msra.mxu1 %v4364_v2  ;;  %1503 = vmatprep.subr.bf16.mxu0 %v4375_v5 }
  0xb9   :  { %1540 = vmatprep.subr.bf16.mxu1 %v4372_v4 }
  0xbb   :  { %1504 = vmatpush2.bf16.msra.mxu0 %v4373_v9 }
  0xbc   :  { %1541 = vmatpush2.bf16.msra.mxu1 %v4370_v8  ;;  %1505 = vmatprep.subr.bf16.mxu0 %v4381_v11 }
  0xbd   :  { %1542 = vmatprep.subr.bf16.mxu1 %v4378_v10 }
  0xbf   :  { %1506 = vmatpush2.bf16.msra.mxu0 %v4379_v15 }
  0xc0   :  { %1543 = vmatpush2.bf16.msra.mxu1 %v4376_v12  ;;  %4041 = vmatprep.subr.bf16.mxu0 %v4391_v17 }
  0xc1   :  { %1544 = vmatprep.subr.bf16.mxu1 %v4384_v16 }
  0xc2   :  { %1508 = vmatmul.mubr.bf16.vlgmr.msra.gmra.mxu0 %v5028_v7  ;;  %v4388_v7 = vld [vmem:[%s6196_s1 + $0x608] ss:$16 sps:$4 sm:$0xff]  }
  0xc3   :  { %4042 = vmatpush3.bf16.msra.mxu0 %v4392_v19 }
  0xc4   :  { %1545 = vmatpush2.bf16.msra.mxu1 %v4382_v18  ;;  %4043 = vmatprep.subr.bf16.mxu0 %v4393_v21 }
  0xc5   :  { %1546 = vmatprep.subr.bf16.mxu1 %v4387_v20 }
  0xc7   :  { %4044 = vmatpush3.bf16.msra.mxu0 %v4394_v24 }
  0xc8   :  { %1547 = vmatpush2.bf16.msra.mxu1 %v4385_v22  ;;  %4045 = vmatprep.subr.bf16.mxu0 %v4395_v25 }
  0xc9   :  { %1571 = vmatprep.subr.bf16.mxu1 %v4390_v23 }
  0xcb   :  { %1549 = vmatmul.mubr.bf16.vlgmr.msra.gmra.mxu1 %v5236_v14  ;;  %4046 = vmatpush3.bf16.msra.mxu0 %v4396_v26  ;;  %v4401_v14 = vld [vmem:[%s6198_s3 + $0x50] sm:$0xff]  }
  0xcc   :  { %1572 = vmatpush1.bf16.msra.mxu1 %v4388_v7  ;;  %1589 = vmatprep.mubr.bf16.mxu1 %v4751_v13 }
  0xcd   :  { %1860 = vmatprep.subr.bf16.mxu1 %v4751_v13  ;;  %4047 = vmatprep.subr.bf16.mxu0 %v4397_v27 }
  0xcf   :  { %4048 = vmatpush3.bf16.msra.mxu0 %v4398_v51 }
  0xd0   :  { %4049 = vmatprep.subr.bf16.mxu0 %v4399_v28 }
  0xd3   :  { %3822 = vmatmul.mubr.msk.bf16.vlgmr.msra.gmra.mxu1 %vm1266_vm0, %v4706_v31  ;;  %4050 = vmatpush3.bf16.msra.mxu0 %v4400_v29 }
  0xd4   :  { %1861 = vmatpush1.bf16.msra.mxu1 %v4407_v30  ;;  %4051 = vmatprep.subr.bf16.mxu0 %v4401_v14 }
  0xd5   :  { %1862 = vmatprep.subr.bf16.mxu1 %v4751_v13 }
  0xd7   :  { %4052 = vmatpush3.bf16.msra.mxu0 %v4402_v32 }
  0xd8   :  { %1863 = vmatpush1.bf16.msra.mxu1 %v4408_v6  ;;  %4053 = vmatprep.subr.bf16.mxu0 %v4403_v34 }
  0xd9   :  { %1864 = vmatprep.subr.bf16.mxu1 %v4751_v13 }
  0xdb   :  { %4054 = vmatpush3.bf16.msra.mxu0 %v4404_v33 }
  0xdc   :  { %4055 = vmatprep.subr.bf16.mxu0 %v4405_v35 }
  0xdd   :  { %18 = vsyncpa [#allocation5], 0  ;;  %v4409_v37 = vld [vmem:[%s6198_s3 + $0xa8] sm:$0xff]   ;;  %v4410_v42 = vld [vmem:[%s6198_s3 + $0xa0] sm:$0xff]   ;;  %s4752_s12 = smov 20   ;;  %v242_v58 = vlaneseq  ;;  %vm1979_vm1 = vcmask 1041408  }
  0xde   :  { %1865 = vmatpush1.bf16.msra.mxu1 %v4409_v37  ;;  %v4411_v47 = vld [vmem:[%s6198_s3 + $0x98] sm:$0xff]   ;;  %v4412_v50 = vld [vmem:[%s6198_s3 + $0x90] sm:$0xff]   ;;  %v4413_v54 = vld [vmem:[%s6198_s3 + $0x88] sm:$0xff]   ;;  %vm1900_vm2 = vcmask 326656   ;;  %s4753_s23 = smov 108   ;;  %vm1975_vm3 = vcmask 162816  }
  0xdf   :  { %4056 = vmatpush3.bf16.msra.mxu0 %v4406_v36  ;;  %1866 = vmatprep.subr.bf16.mxu1 %v4751_v13  ;;  %v4414_v55 = vld [vmem:[%s6198_s3 + $0x80] sm:$0xff]   ;;  %v5540_v59 = vshrl.u32 %v242_v58, 7 }
  0xe0   :  { %v4415_v56 = vld [vmem:[%s6198_s3 + $0xc0] sm:$0xff]  }
  0xe1   :  { %v1905_v57 = vld [vmem:[%s6204_s9] sm:$0xff]  ;;  %v5543_v60 = vsub.s32 0, %v5540_v59  ;;  %v5549_v62 = vsub.s32 1, %v5540_v59  ;;  %v5554_v51 = vsub.s32 2, %v5540_v59  ;;  %v5557_v29 = vsub.s32 3, %v5540_v59 }
  0xe2   :  { %1867 = vmatpush1.bf16.msra.mxu1 %v4410_v42  ;;  %1907 = vrot.lane.b32.xlu0 %v1905_v57, %s4752_s12  ;;  %v240_v61 = vld [vmem:[%s6197_s2] sm:$0xf] }
  0xe3   :  { %1868 = vmatprep.subr.bf16.mxu1 %v4751_v13  ;;  %v245_v63 = vrot.slane %v240_v61, %v5543_v60  ;;  %v249_v0 = vrot.slane %v240_v61, %v5549_v62  ;;  %v253_v30 = vrot.slane %v240_v61, %v5554_v51  ;;  %v257_v31 = vrot.slane %v240_v61, %v5557_v29 }
  0xe6   :  { %1869 = vmatpush1.bf16.msra.mxu1 %v4411_v47 }
  0xe7   :  { %1870 = vmatprep.subr.bf16.mxu1 %v4751_v13 }
  0xea   :  { %1871 = vmatpush1.bf16.msra.mxu1 %v4412_v50 }
  0xeb   :  { %1872 = vmatprep.subr.bf16.mxu1 %v4751_v13 }
  0xee   :  { %1873 = vmatpush1.bf16.msra.mxu1 %v4413_v54  ;;  %v1921_v54 = vld [vmem:[%s6200_s5 + $0x20] sm:$0x33] }
  0xef   :  { %1874 = vmatprep.subr.bf16.mxu1 %v4751_v13 }
  0xf2   :  { %1875 = vmatpush1.bf16.msra.mxu1 %v4414_v55  ;;  %v3855_v55 = vcombine.high %v1921_v54, %v1921_v54 }
  0xf3   :  { %1890 = vmatprep.subr.bf16.mxu1 %v4751_v13 }
  0xf6   :  { %1891 = vmatpush2.bf16.msra.mxu1 %v4415_v56  ;;  %v3854_v56 = vcombine.low %v1921_v54, %v1921_v54  ;;  %v4425_v54 = vld [vmem:[%s6200_s5 + $0xc] ss:$16 sps:$4 sm:$0xff]  }
  0xf7   :  { %3858 = vmatprep.subr.msk.bf16.mxu1 %vm1979_vm1, %v3855_v55  ;;  %v4423_v55 = vld [vmem:[%s6200_s5 + $0x8] ss:$16 sps:$4 sm:$0xff]  }
  0xf8   :  { %v1981_v57 = vsel %vm1979_vm1, %v3854_v56, 0  ;;  %v4458_v56 = vld [vmem:[%s6202_s7 + $0x50c] ss:$28 sps:$4 sm:$0xff]  }
 0x102   :  { %v1304_v38 = vpop.f32.mrf.mxu0 }
 0x103   :  { %v1345_v39 = vpop.f32.mrf.mxu1  ;;  %v1305_v1 = vadd.f32 %v1304_v38, %v245_v63 }
 0x104   :  { %v1306_v40 = vpop.f32.mrf.mxu0 }
 0x105   :  { %v1347_v41 = vpop.f32.mrf.mxu1  ;;  %v1307_v2 = vadd.f32 %v1306_v40, %v249_v0  ;;  %v1346_v3 = vadd.f32 %v1345_v39, %v1305_v1 }
 0x106   :  { %v1308_v44 = vpop.f32.mrf.mxu0 }
 0x107   :  { %v1349_v43 = vpop.f32.mrf.mxu1  ;;  %v1348_v5 = vadd.f32 %v1347_v41, %v1307_v2  ;;  %v3823_v2 = vld [vmem:[%s6199_s4] ss:$0 sm:$0xff] }
 0x108   :  { %v1309_v46 = vpop.f32.mrf.mxu0 }
 0x109   :  { %v1350_v45 = vpop.f32.mrf.mxu1 }
 0x10b   :  { %v1427_v48 = vpop.f32.mrf.mxu1 }
 0x10d   :  { %v1429_v49 = vpop.f32.mrf.mxu1 }
 0x10f   :  { %v1431_v52 = vpop.f32.mrf.mxu1 }
 0x111   :  { %v1432_v53 = vpop.f32.mrf.mxu1 }
 0x142   :  { %v1386_v4 = vpop.f32.mrf.mxu0 }
 0x143   :  { %v1387_v8 = vadd.f32 %v1386_v4, %v1346_v3 }
 0x144   :  { %v1388_v9 = vpop.f32.mrf.mxu0 }
 0x145   :  { %v1428_v10 = vadd.f32 %v1427_v48, %v1387_v8  ;;  %v1389_v11 = vadd.f32 %v1388_v9, %v1348_v5 }
 0x146   :  { %v1390_v12 = vpop.f32.mrf.mxu0 }
 0x147   :  { %v1598_v15 = vmul.f32 0.2, %v1428_v10  ;;  %v1430_v16 = vadd.f32 %v1429_v49, %v1389_v11 }
 0x148   :  { %v1391_v17 = vpop.f32.mrf.mxu0 }
 0x149   :  { %v1599_v18 = vmul.f32 0.2, %v1430_v16  ;;  %v1602_v19 = vmax.f32 %v1428_v10, %v1598_v15  ;;  %v4420_v15 = vld [vmem:[%s6200_s5 + $0x4] ss:$16 sps:$4 sm:$0xff]   ;;  %v5584_v17 = vld [vmem:[%s6200_s5 + $0x28] sm:$0x33] }
 0x14b   :  { %v1468_v20 = vpop.f32.mrf.mxu1  ;;  %v1603_v21 = vmax.f32 %v1430_v16, %v1599_v18  ;;  %v1606_v24 = vpack.c.bf16 %v1602_v19, %v1602_v19  ;;  %v4418_v16 = vld [vmem:[%s6200_s5] ss:$16 sps:$4 sm:$0xff]   ;;  %v3857_v18 = vcombine.high %v5584_v17, %v5584_v17 }
 0x14c   :  { %v1469_v34 = vadd.f32 %v1468_v20, %v253_v30  ;;  %v4438_v30 = vld [vmem:[%s6202_s7 + $0xa8] ss:$28 sps:$4 sm:$0xff]  }
 0x14d   :  { %v1470_v22 = vpop.f32.mrf.mxu1  ;;  %v1607_v23 = vpack.c.bf16 %v1603_v21, %v1603_v21 }
 0x14e   :  { %v1471_v35 = vadd.f32 %v1470_v22, %v257_v31  ;;  %v4426_v22 = vld [vmem:[%s6202_s7 + $0x188] ss:$28 sps:$4 sm:$0xff]   ;;  %v4441_v31 = vld [vmem:[%s6202_s7 + $0x70] ss:$28 sps:$4 sm:$0xff]  }
 0x14f   :  { %v1472_v25 = vpop.f32.mrf.mxu1  ;;  %1852 = vmatprep.mubr.bf16.mxu0 %v1607_v23  ;;  %v4428_v23 = vld [vmem:[%s6202_s7 + $0x18c] ss:$28 sps:$4 sm:$0xff]  }
 0x150   :  { %1853 = vmatmul.mubr.bf16.vlgmr.msra.gmra.mxu0 %v1606_v24  ;;  %v4431_v24 = vld [vmem:[%s6202_s7 + $0x154] ss:$28 sps:$4 sm:$0xff]   ;;  %3222 = vmatprep.subr.bf16.mxu0 %v4428_v23  ;;  %v1923_v23 = vld [vmem:[%s6201_s6] sm:$0xf] }
 0x151   :  { %v1473_v7 = vpop.f32.mrf.mxu1  ;;  %3223 = vmatpush1.bf16.msra.mxu0 %v4426_v22  ;;  %v4429_v25 = vld [vmem:[%s6202_s7 + $0x150] ss:$28 sps:$4 sm:$0xff]  }
 0x152   :  { %3224 = vmatprep.subr.bf16.mxu0 %v4431_v24  ;;  %v4434_v7 = vld [vmem:[%s6202_s7 + $0x11c] ss:$28 sps:$4 sm:$0xff]   ;;  %v4509_v22 = vld [vmem:[%s6202_s7 + $0x194] ss:$28 sps:$4 sm:$0xff]   ;;  %v1928_v24 = vrot.slane %v1923_v23, %v5543_v60 }
 0x154   :  { %v1908_v19 = vpop.permute.xlu0 %1907 }
 0x155   :  { %3225 = vmatpush1.bf16.msra.mxu0 %v4429_v25  ;;  %v1932_v25 = vrot.slane %v1923_v23, %v5549_v62 }
 0x156   :  { %3226 = vmatprep.subr.bf16.mxu0 %v4434_v7 }
 0x182   :  { %v1509_v26 = vpop.f32.mrf.mxu0 }
 0x183   :  { %v1510_v36 = vadd.f32 %v1509_v26, %v1469_v34  ;;  %v4432_v26 = vld [vmem:[%s6202_s7 + $0x118] ss:$28 sps:$4 sm:$0xff]  }
 0x184   :  { %v1511_v27 = vpop.f32.mrf.mxu0  ;;  %3227 = vmatpush1.bf16.msra.mxu0 %v4432_v26  ;;  %v4444_v34 = vld [vmem:[%s6202_s7 + $0x38] ss:$28 sps:$4 sm:$0xff]  }
 0x185   :  { %v1512_v38 = vadd.f32 %v1511_v27, %v1471_v35  ;;  %v4437_v27 = vld [vmem:[%s6202_s7 + $0xe4] ss:$28 sps:$4 sm:$0xff]  }
 0x186   :  { %v1513_v28 = vpop.f32.mrf.mxu0  ;;  %3228 = vmatprep.subr.bf16.mxu0 %v4437_v27  ;;  %v4447_v35 = vld [vmem:[%s6202_s7] ss:$28 sps:$4 sm:$0xff]  }
 0x187   :  { %v4435_v28 = vld [vmem:[%s6202_s7 + $0xe0] ss:$28 sps:$4 sm:$0xff]  }
 0x188   :  { %v1514_v14 = vpop.f32.mrf.mxu0  ;;  %3229 = vmatpush1.bf16.msra.mxu0 %v4435_v28 }
 0x189   :  { %v4440_v14 = vld [vmem:[%s6202_s7 + $0xac] ss:$28 sps:$4 sm:$0xff]  }
 0x18a   :  { %3230 = vmatprep.subr.bf16.mxu0 %v4440_v14 }
 0x18b   :  { %v1550_v6 = vpop.f32.mrf.mxu1 }
 0x18c   :  { %v1551_v39 = vadd.f32 %v1550_v6, %v1510_v36  ;;  %v4443_v6 = vld [vmem:[%s6202_s7 + $0x74] ss:$28 sps:$4 sm:$0xff]   ;;  %3231 = vmatpush1.bf16.msra.mxu0 %v4438_v30  ;;  %v4452_v36 = vld [vmem:[%s6202_s7 + $0x34c] ss:$28 sps:$4 sm:$0xff]  }
 0x18d   :  { %v1552_v32 = vpop.f32.mrf.mxu1  ;;  %3232 = vmatprep.subr.bf16.mxu0 %v4443_v6 }
 0x18e   :  { %v1553_v41 = vadd.f32 %v1552_v32, %v1512_v38  ;;  %v4446_v32 = vld [vmem:[%s6202_s7 + $0x3c] ss:$28 sps:$4 sm:$0xff]   ;;  %v4455_v38 = vld [vmem:[%s6202_s7 + $0x314] ss:$28 sps:$4 sm:$0xff]  }
 0x18f   :  { %v1554_v33 = vpop.f32.mrf.mxu1 }
 0x190   :  { %3233 = vmatpush1.bf16.msra.mxu0 %v4441_v31  ;;  %v4449_v33 = vld [vmem:[%s6202_s7 + $0x4] ss:$28 sps:$4 sm:$0xff]   ;;  %v1936_v31 = vrot.slane %v1923_v23, %v5554_v51 }
 0x191   :  { %v1555_v37 = vpop.f32.mrf.mxu1  ;;  %3234 = vmatprep.subr.bf16.mxu0 %v4446_v32 }
 0x192   :  { %v4450_v37 = vld [vmem:[%s6202_s7 + $0x348] ss:$28 sps:$4 sm:$0xff]  }
 0x193   :  { %v1591_v40 = vpop.f32.mrf.mxu1 }
 0x194   :  { %v1592_v42 = vadd.f32 %v1591_v40, %v1551_v39  ;;  %3235 = vmatpush1.bf16.msra.mxu0 %v4444_v34  ;;  %v4453_v39 = vld [vmem:[%s6202_s7 + $0x310] ss:$28 sps:$4 sm:$0xff]   ;;  %v4461_v40 = vld [vmem:[%s6202_s7 + $0x2dc] ss:$28 sps:$4 sm:$0xff]  }
 0x195   :  { %v1593_v43 = vpop.f32.mrf.mxu1  ;;  %3236 = vmatprep.subr.bf16.mxu0 %v4449_v33  ;;  %v4498_v33 = vld [vmem:[%s6202_s7 + $0x510] ss:$28 sps:$4 sm:$0xff]  }
 0x196   :  { %v1600_v44 = vmul.f32 0.2, %v1592_v42  ;;  %v1594_v45 = vadd.f32 %v1593_v43, %v1553_v41  ;;  %v4459_v41 = vld [vmem:[%s6202_s7 + $0x2d8] ss:$28 sps:$4 sm:$0xff]   ;;  %v4465_v43 = vld [vmem:[%s6202_s7 + $0x2a0] ss:$28 sps:$4 sm:$0xff]  }
 0x197   :  { %v1595_v46 = vpop.f32.mrf.mxu1 }
 0x198   :  { %v1601_v47 = vmul.f32 0.2, %v1594_v45  ;;  %v1604_v48 = vmax.f32 %v1592_v42, %v1600_v44  ;;  %3237 = vmatpush1.bf16.msra.mxu0 %v4447_v35  ;;  %v4467_v42 = vld [vmem:[%s6202_s7 + $0x2a4] ss:$28 sps:$4 sm:$0xff]   ;;  %v4473_v44 = vld [vmem:[%s6202_s7 + $0x26c] ss:$28 sps:$4 sm:$0xff]   ;;  %v1940_v35 = vrot.slane %v1923_v23, %v5557_v29 }
 0x199   :  { %v1596_v49 = vpop.f32.mrf.mxu1  ;;  %3238 = vmatprep.subr.bf16.mxu0 %v4452_v36  ;;  %v4479_v46 = vld [vmem:[%s6202_s7 + $0x234] ss:$28 sps:$4 sm:$0xff]  }
 0x19a   :  { %v1605_v50 = vmax.f32 %v1594_v45, %v1601_v47  ;;  %v1608_v53 = vpack.c.bf16 %v1604_v48, %v1604_v48  ;;  %v4471_v45 = vld [vmem:[%s6202_s7 + $0x268] ss:$28 sps:$4 sm:$0xff]   ;;  %v4477_v47 = vld [vmem:[%s6202_s7 + $0x230] ss:$28 sps:$4 sm:$0xff]   ;;  %v3856_v48 = vcombine.low %v5584_v17, %v5584_v17  ;;  %v4552_v23 = vld [vmem:[%s6202_s7 + $0x198] ss:$28 sps:$4 sm:$0xff]  }
 0x19b   :  { %v4497_v17 = vld [vmem:[%s6202_s7 + $0x384] ss:$28 sps:$4 sm:$0xff]  }
 0x19c   :  { %v1609_v52 = vpack.c.bf16 %v1605_v50, %v1605_v50  ;;  %3239 = vmatpush2.bf16.msra.mxu0 %v4450_v37 }
 0x19d   :  { %3240 = vmatprep.subr.bf16.mxu0 %v4455_v38  ;;  %v4506_v38 = vld [vmem:[%s6202_s7 + $0x4dc] ss:$28 sps:$4 sm:$0xff]  }
 0x19e   :  { %3849 = vmatprep.mubr.msk.bf16.mxu1 %vm1266_vm0, %v1609_v52 }
 0x19f   :  { %1893 = vmatmul.mubr.bf16.vlgmr.msra.gmra.mxu1 %v1608_v53  ;;  %v1987_v53 = vsel %vm1979_vm1, %v3856_v48, 0 }
 0x1a0   :  { %2024 = vmatprep.mubr.bf16.mxu1 %v4751_v13  ;;  %2005 = vmatpush1.bf16.msra.mxu1 %v1981_v57  ;;  %v4456_v57 = vld [vmem:[%s6202_s7 + $0x508] ss:$28 sps:$4 sm:$0xff]  }
 0x1a1   :  { %2006 = vmatprep.subr.bf16.mxu1 %v4420_v15  ;;  %3241 = vmatpush2.bf16.msra.mxu0 %v4453_v39  ;;  %v4489_v15 = vld [vmem:[%s6202_s7 + $0x1c0] ss:$28 sps:$4 sm:$0xff]  }
 0x1a2   :  { %3242 = vmatprep.subr.bf16.mxu0 %v4461_v40 }
 0x1a4   :  { %2007 = vmatpush1.bf16.msra.mxu1 %v4418_v16  ;;  %v4492_v16 = vld [vmem:[%s6202_s7 + $0x3b8] ss:$28 sps:$4 sm:$0xff]  }
 0x1a5   :  { %3860 = vmatprep.subr.msk.bf16.mxu1 %vm1979_vm1, %v3857_v18  ;;  %3243 = vmatpush2.bf16.msra.mxu0 %v4459_v41  ;;  %v4500_v18 = vld [vmem:[%s6202_s7 + $0x514] ss:$28 sps:$4 sm:$0xff]  }
 0x1a6   :  { %3244 = vmatprep.subr.bf16.mxu0 %v4467_v42  ;;  %v4504_v42 = vld [vmem:[%s6202_s7 + $0x4d8] ss:$28 sps:$4 sm:$0xff]  }
 0x1a9   :  { %3245 = vmatpush2.bf16.msra.mxu0 %v4465_v43 }
 0x1aa   :  { %3246 = vmatprep.subr.bf16.mxu0 %v4473_v44 }
 0x1ad   :  { %3247 = vmatpush2.bf16.msra.mxu0 %v4471_v45  ;;  %v4512_v45 = vld [vmem:[%s6202_s7 + $0x4a4] ss:$28 sps:$4 sm:$0xff]  }
 0x1ae   :  { %3248 = vmatprep.subr.bf16.mxu0 %v4479_v46 }
 0x1b1   :  { %3249 = vmatpush2.bf16.msra.mxu0 %v4477_v47 }
 0x210   :  { %v4057_v58 = vpop.f32.mrf.mxu0 }
 0x212   :  { %v4058_v61 = vpop.f32.mrf.mxu0 }
 0x213   :  { %v4059_v63 = vadd.f32 %v4058_v61, %v4057_v58  ;;  %v4464_v58 = vld [vmem:[%s6202_s7 + $0x4d4] ss:$28 sps:$4 sm:$0xff]  }
 0x214   :  { %v4060_v0 = vpop.f32.mrf.mxu0  ;;  %v4462_v61 = vld [vmem:[%s6202_s7 + $0x4d0] ss:$28 sps:$4 sm:$0xff]  }
 0x215   :  { %v1855_v3 = vadd.f32 %v4059_v63, %v3823_v2  ;;  %v4470_v63 = vld [vmem:[%s6202_s7 + $0x49c] ss:$28 sps:$4 sm:$0xff]  }
 0x216   :  { %v4061_v1 = vpop.f32.mrf.mxu0  ;;  %v4468_v0 = vld [vmem:[%s6202_s7 + $0x498] ss:$28 sps:$4 sm:$0xff]   ;;  %v4474_v2 = vld [vmem:[%s6202_s7 + $0x460] ss:$28 sps:$4 sm:$0xff]  }
 0x217   :  { %v4476_v1 = vld [vmem:[%s6202_s7 + $0x464] ss:$28 sps:$4 sm:$0xff]  }
 0x25f   :  { %v1894_v4 = vpop.f32.mrf.mxu1 }
 0x260   :  { %v5571_v5 = vadd.f32 %v1894_v4, %v1855_v3  ;;  %v4482_v3 = vld [vmem:[%s6202_s7 + $0x42c] ss:$28 sps:$4 sm:$0xff]  }
 0x261   :  { %v1896_v8 = vpop.f32.mrf.mxu1  ;;  %v4480_v4 = vld [vmem:[%s6202_s7 + $0x428] ss:$28 sps:$4 sm:$0xff]  }
 0x262   :  { %v1902_v9 = vmul.f32 0.5, %v5571_v5  ;;  %1901 = vst.msk [vmem:[#allocation4] sm:$0xff] %vm1900_vm2, %v5571_v5  ;;  %v4488_v8 = vld [vmem:[%s6202_s7 + $0x3f4] ss:$28 sps:$4 sm:$0xff]  }
 0x263   :  { %v1897_v10 = vpop.f32.mrf.mxu1 }
 0x264   :  { %v1903_v11 = vmul.f32 1.442695, %v1902_v9  ;;  %v4483_v9 = vld [vmem:[%s6202_s7 + $0x1f8] ss:$28 sps:$4 sm:$0xff]   ;;  %v4486_v10 = vld [vmem:[%s6202_s7 + $0x3f0] ss:$28 sps:$4 sm:$0xff]  }
 0x265   :  { %v1898_v12 = vpop.f32.mrf.mxu1 }
 0x266   :  { %4676 = vpow2.f32 %v1903_v11  ;;  %v4491_v11 = vld [vmem:[%s6202_s7 + $0x1c4] ss:$28 sps:$4 sm:$0xff]   ;;  %v4494_v12 = vld [vmem:[%s6202_s7 + $0x3bc] ss:$28 sps:$4 sm:$0xff]  }
 0x273   :  { %v4677_v20 = vpop.eup %4676 }
 0x274   :  { %v1910_v21 = vmul.f32 %v4677_v20, %v1908_v19  ;;  %v4495_v19 = vld [vmem:[%s6202_s7 + $0x380] ss:$28 sps:$4 sm:$0xff]  }
 0x275   :  { %v4503_v20 = vld [vmem:[%s6202_s7 + $0x544] ss:$28 sps:$4 sm:$0xff]  }
 0x276   :  { %1912 = vrot.lane.b32.xlu0 %v1910_v21, %s4753_s23  ;;  %v4501_v21 = vld [vmem:[%s6202_s7 + $0x540] ss:$28 sps:$4 sm:$0xff]  }
 0x2e8   :  { %v1913_v49 = vpop.permute.xlu0 %1912 }
 0x2e9   :  { %v1915_v50 = vadd.f32 %v1913_v49, %v5571_v5  ;;  %v4485_v5 = vld [vmem:[%s6202_s7 + $0x1fc] ss:$28 sps:$4 sm:$0xff]   ;;  %v4507_v49 = vld [vmem:[%s6202_s7 + $0x190] ss:$28 sps:$4 sm:$0xff]  }
 0x2ea   :  { %3250 = vmatprep.subr.bf16.mxu0 %v4485_v5  ;;  %v4536_v5 = vld [vmem:[%s6202_s7 + $0x3c4] ss:$28 sps:$4 sm:$0xff]  }
 0x2eb   :  { %v1916_v52 = vpack.c.bf16 %v1915_v50, %v1915_v50  ;;  %3251 = vmatpush2.bf16.msra.mxu0 %v4483_v9  ;;  %v4510_v50 = vld [vmem:[%s6202_s7 + $0x4a0] ss:$28 sps:$4 sm:$0xff]  }
 0x2ec   :  { %3252 = vmatprep.subr.bf16.mxu0 %v4491_v11  ;;  %v4534_v9 = vld [vmem:[%s6202_s7 + $0x3c0] ss:$28 sps:$4 sm:$0xff]   ;;  %v4542_v11 = vld [vmem:[%s6202_s7 + $0x38c] ss:$28 sps:$4 sm:$0xff]  }
 0x2ed   :  { %3859 = vmatmul.mubr.msk.bf16.vlgmr.msra.gmra.mxu1 %vm1975_vm3, %v1916_v52 }
 0x2ee   :  { %2046 = vmatpush1.bf16.msra.mxu1 %v1987_v53  ;;  %2065 = vmatprep.mubr.bf16.mxu1 %v4751_v13  ;;  %v4515_v53 = vld [vmem:[%s6202_s7 + $0x15c] ss:$28 sps:$4 sm:$0xff]  }
 0x2ef   :  { %2047 = vmatprep.subr.bf16.mxu1 %v4425_v54  ;;  %3253 = vmatpush2.bf16.msra.mxu0 %v4489_v15  ;;  %v4518_v54 = vld [vmem:[%s6202_s7 + $0x46c] ss:$28 sps:$4 sm:$0xff]  }
 0x2f0   :  { %3345 = vmatprep.subr.bf16.mxu0 %v4500_v18  ;;  %v4540_v15 = vld [vmem:[%s6202_s7 + $0x388] ss:$28 sps:$4 sm:$0xff]   ;;  %v4543_v18 = vld [vmem:[%s6202_s7 + $0x40] ss:$28 sps:$4 sm:$0xff]  }
 0x2f2   :  { %2048 = vmatpush1.bf16.msra.mxu1 %v4423_v55  ;;  %v4513_v55 = vld [vmem:[%s6202_s7 + $0x158] ss:$28 sps:$4 sm:$0xff]  }
 0x2f3   :  { %3263 = vmatprep.subr.bf16.mxu1 %v4458_v56  ;;  %v4516_v56 = vld [vmem:[%s6202_s7 + $0x468] ss:$28 sps:$4 sm:$0xff]  }
 0x2f5   :  { %3861 = vmatmul.mubr.msk.bf16.vlgmr.msra.gmra.mxu1 %vm1975_vm3, %v1916_v52 }
 0x2f6   :  { %3264 = vmatpush1.bf16.msra.mxu1 %v4456_v57  ;;  %v4521_v57 = vld [vmem:[%s6202_s7 + $0x124] ss:$28 sps:$4 sm:$0xff]  }
 0x2f7   :  { %3265 = vmatprep.subr.bf16.mxu1 %v4464_v58  ;;  %v4524_v58 = vld [vmem:[%s6202_s7 + $0x434] ss:$28 sps:$4 sm:$0xff]  }
 0x2fa   :  { %3266 = vmatpush1.bf16.msra.mxu1 %v4462_v61  ;;  %v4519_v61 = vld [vmem:[%s6202_s7 + $0x120] ss:$28 sps:$4 sm:$0xff]  }
 0x2fb   :  { %3267 = vmatprep.subr.bf16.mxu1 %v4470_v63  ;;  %v4522_v63 = vld [vmem:[%s6202_s7 + $0x430] ss:$28 sps:$4 sm:$0xff]  }
 0x2fe   :  { %3268 = vmatpush1.bf16.msra.mxu1 %v4468_v0  ;;  %v4527_v0 = vld [vmem:[%s6202_s7 + $0xec] ss:$28 sps:$4 sm:$0xff]  }
 0x2ff   :  { %3269 = vmatprep.subr.bf16.mxu1 %v4476_v1  ;;  %v4530_v1 = vld [vmem:[%s6202_s7 + $0x3fc] ss:$28 sps:$4 sm:$0xff]  }
 0x302   :  { %3270 = vmatpush1.bf16.msra.mxu1 %v4474_v2  ;;  %v4525_v2 = vld [vmem:[%s6202_s7 + $0xe8] ss:$28 sps:$4 sm:$0xff]  }
 0x303   :  { %3271 = vmatprep.subr.bf16.mxu1 %v4482_v3  ;;  %v4528_v3 = vld [vmem:[%s6202_s7 + $0x3f8] ss:$28 sps:$4 sm:$0xff]  }
 0x306   :  { %3272 = vmatpush1.bf16.msra.mxu1 %v4480_v4  ;;  %v4533_v4 = vld [vmem:[%s6202_s7 + $0xb4] ss:$28 sps:$4 sm:$0xff]  }
 0x307   :  { %3273 = vmatprep.subr.bf16.mxu1 %v4488_v8  ;;  %v4531_v8 = vld [vmem:[%s6202_s7 + $0xb0] ss:$28 sps:$4 sm:$0xff]  }
 0x30a   :  { %3274 = vmatpush1.bf16.msra.mxu1 %v4486_v10  ;;  %v4539_v10 = vld [vmem:[%s6202_s7 + $0x7c] ss:$28 sps:$4 sm:$0xff]  }
 0x30b   :  { %3275 = vmatprep.subr.bf16.mxu1 %v4494_v12  ;;  %v4537_v12 = vld [vmem:[%s6202_s7 + $0x78] ss:$28 sps:$4 sm:$0xff]  }
 0x30e   :  { %3276 = vmatpush1.bf16.msra.mxu1 %v4492_v16  ;;  %v4545_v16 = vld [vmem:[%s6202_s7 + $0x44] ss:$28 sps:$4 sm:$0xff]  }
 0x30f   :  { %3277 = vmatprep.subr.bf16.mxu1 %v4497_v17  ;;  %v4548_v17 = vld [vmem:[%s6202_s7 + $0x54c] ss:$28 sps:$4 sm:$0xff]  }
 0x312   :  { %3278 = vmatpush1.bf16.msra.mxu1 %v4495_v19  ;;  %v4546_v19 = vld [vmem:[%s6202_s7 + $0x548] ss:$28 sps:$4 sm:$0xff]  }
 0x313   :  { %3293 = vmatprep.subr.bf16.mxu1 %v4503_v20  ;;  %v4551_v20 = vld [vmem:[%s6202_s7 + $0xc] ss:$28 sps:$4 sm:$0xff]  }
 0x316   :  { %3294 = vmatpush2.bf16.msra.mxu1 %v4501_v21  ;;  %v4554_v21 = vld [vmem:[%s6202_s7 + $0x19c] ss:$28 sps:$4 sm:$0xff]  }
 0x317   :  { %3304 = vmatprep.subr.bf16.mxu1 %v4509_v22  ;;  %v4549_v22 = vld [vmem:[%s6202_s7 + $0x8] ss:$28 sps:$4 sm:$0xff]  }
 0x3ad   :  { %v2026_v7 = vpop.f32.mrf.mxu1 }
 0x3ae   :  { %v2027_v26 = vadd.f32 %v2026_v7, %v1928_v24  ;;  %v4557_v24 = vld [vmem:[%s6202_s7 + $0x354] ss:$28 sps:$4 sm:$0xff]  }
 0x3af   :  { %v2028_v27 = vpop.f32.mrf.mxu1  ;;  %v4555_v7 = vld [vmem:[%s6202_s7 + $0x350] ss:$28 sps:$4 sm:$0xff]  }
 0x3b0   :  { %v2029_v28 = vadd.f32 %v2028_v27, %v1932_v25  ;;  %v2074_v14 = vmax.f32 %v2027_v26, 0.0  ;;  %v4560_v25 = vld [vmem:[%s6202_s7 + $0x164] ss:$28 sps:$4 sm:$0xff]   ;;  %v4563_v27 = vld [vmem:[%s6202_s7 + $0x31c] ss:$28 sps:$4 sm:$0xff]  }
 0x3b1   :  { %v2030_v30 = vpop.f32.mrf.mxu1  ;;  %v4558_v26 = vld [vmem:[%s6202_s7 + $0x160] ss:$28 sps:$4 sm:$0xff]  }
 0x3b2   :  { %v2075_v6 = vmax.f32 %v2029_v28, 0.0  ;;  %v5768_v36 = vpack.c.bf16 %v2074_v14, %v2074_v14  ;;  %v4566_v28 = vld [vmem:[%s6202_s7 + $0x12c] ss:$28 sps:$4 sm:$0xff]   ;;  %v4561_v14 = vld [vmem:[%s6202_s7 + $0x318] ss:$28 sps:$4 sm:$0xff]  }
 0x3b3   :  { %v2031_v32 = vpop.f32.mrf.mxu1  ;;  %v4564_v30 = vld [vmem:[%s6202_s7 + $0x128] ss:$28 sps:$4 sm:$0xff]  }
 0x3b4   :  { %v5762_v34 = vpack.c.bf16 %v2075_v6, %v2075_v6  ;;  %v4569_v6 = vld [vmem:[%s6202_s7 + $0x2e4] ss:$28 sps:$4 sm:$0xff]  }
 0x3b5   :  { %v2067_v37 = vpop.f32.mrf.mxu1  ;;  %v4567_v32 = vld [vmem:[%s6202_s7 + $0x2e0] ss:$28 sps:$4 sm:$0xff]  }
 0x3b6   :  { %v2068_v39 = vadd.f32 %v2067_v37, %v1936_v31  ;;  %3254 = vmatprep.mubr.bf16.mxu0 %v5762_v34  ;;  %v4572_v31 = vld [vmem:[%s6202_s7 + $0xf4] ss:$28 sps:$4 sm:$0xff]   ;;  %v4578_v37 = vld [vmem:[%s6202_s7 + $0xbc] ss:$28 sps:$4 sm:$0xff]  }
 0x3b7   :  { %v2069_v40 = vpop.f32.mrf.mxu1  ;;  %3255 = vmatmul.mubr.bf16.vlgmr.msra.gmra.mxu0 %v5768_v36 }
 0x3b8   :  { %v2070_v41 = vadd.f32 %v2069_v40, %v1940_v35  ;;  %3346 = vmatpush1.bf16.msra.mxu0 %v4498_v33  ;;  %v2076_v43 = vmax.f32 %v2068_v39, 0.0  ;;  %v4570_v33 = vld [vmem:[%s6202_s7 + $0xf0] ss:$28 sps:$4 sm:$0xff]   ;;  %v4576_v39 = vld [vmem:[%s6202_s7 + $0xb8] ss:$28 sps:$4 sm:$0xff]  }
 0x3b9   :  { %v2071_v44 = vpop.f32.mrf.mxu1  ;;  %3347 = vmatprep.subr.bf16.mxu0 %v4506_v38  ;;  %v4575_v35 = vld [vmem:[%s6202_s7 + $0x2ac] ss:$28 sps:$4 sm:$0xff]   ;;  %v4581_v40 = vld [vmem:[%s6202_s7 + $0x274] ss:$28 sps:$4 sm:$0xff]  }
 0x3ba   :  { %v2077_v46 = vmax.f32 %v2070_v41, 0.0  ;;  %v5789_v52 = vpack.c.bf16 %v2076_v43, %v2076_v43  ;;  %v4573_v38 = vld [vmem:[%s6202_s7 + $0x2a8] ss:$28 sps:$4 sm:$0xff]   ;;  %v4582_v43 = vld [vmem:[%s6202_s7 + $0x80] ss:$28 sps:$4 sm:$0xff]  }
 0x3bb   :  { %v2072_v47 = vpop.f32.mrf.mxu1  ;;  %v4584_v41 = vld [vmem:[%s6202_s7 + $0x84] ss:$28 sps:$4 sm:$0xff]   ;;  %v4587_v44 = vld [vmem:[%s6202_s7 + $0x23c] ss:$28 sps:$4 sm:$0xff]  }
 0x3bc   :  { %v5781_v48 = vpack.c.bf16 %v2077_v46, %v2077_v46  ;;  %3348 = vmatpush1.bf16.msra.mxu0 %v4504_v42  ;;  %v4579_v42 = vld [vmem:[%s6202_s7 + $0x270] ss:$28 sps:$4 sm:$0xff]   ;;  %v4585_v46 = vld [vmem:[%s6202_s7 + $0x238] ss:$28 sps:$4 sm:$0xff]   ;;  %v4588_v47 = vld [vmem:[%s6202_s7 + $0x48] ss:$28 sps:$4 sm:$0xff]  }
 0x3bd   :  { %3349 = vmatprep.subr.bf16.mxu0 %v4512_v45  ;;  %v4590_v45 = vld [vmem:[%s6202_s7 + $0x4c] ss:$28 sps:$4 sm:$0xff]  }
 0x3be   :  { %4037 = vmatprep.mubr.msk.bf16.mxu1 %vm1266_vm0, %v5781_v48  ;;  %4038 = vmatprep.mubr.msk.bf16.mxu0 %vm1266_vm0, %v5781_v48 }
 0x3bf   :  { %3296 = vmatmul.mubr.bf16.vlgmr.msra.gmra.mxu1 %v5789_v52 }
 0x3c0   :  { %3305 = vmatpush1.bf16.msra.mxu1 %v4507_v49  ;;  %3350 = vmatpush1.bf16.msra.mxu0 %v4510_v50  ;;  %v4593_v49 = vld [vmem:[%s6202_s7 + $0x204] ss:$28 sps:$4 sm:$0xff]   ;;  %v4596_v50 = vld [vmem:[%s6202_s7 + $0x14] ss:$28 sps:$4 sm:$0xff]  }
 0x3c1   :  { %3336 = vmatprep.mubr.bf16.mxu1 %v5762_v34  ;;  %3306 = vmatprep.subr.bf16.mxu1 %v4515_v53  ;;  %v4591_v53 = vld [vmem:[%s6202_s7 + $0x200] ss:$28 sps:$4 sm:$0xff]  }
 0x3c2   :  { %3351 = vmatprep.subr.bf16.mxu0 %v4518_v54  ;;  %v4594_v54 = vld [vmem:[%s6202_s7 + $0x10] ss:$28 sps:$4 sm:$0xff]  }
 0x3c4   :  { %3307 = vmatpush1.bf16.msra.mxu1 %v4513_v55  ;;  %3352 = vmatpush1.bf16.msra.mxu0 %v4516_v56  ;;  %v4599_v55 = vld [vmem:[%s6202_s7 + $0x1cc] ss:$28 sps:$4 sm:$0xff]   ;;  %v4602_v56 = vld [vmem:[%s6202_s7 + $0x35c] ss:$28 sps:$4 sm:$0xff]  }
 0x3c5   :  { %3308 = vmatprep.subr.bf16.mxu1 %v4521_v57  ;;  %3353 = vmatprep.subr.bf16.mxu0 %v4524_v58  ;;  %v4597_v57 = vld [vmem:[%s6202_s7 + $0x1c8] ss:$28 sps:$4 sm:$0xff]   ;;  %v4600_v58 = vld [vmem:[%s6202_s7 + $0x358] ss:$28 sps:$4 sm:$0xff]  }
 0x3c8   :  { %3309 = vmatpush1.bf16.msra.mxu1 %v4519_v61  ;;  %3354 = vmatpush1.bf16.msra.mxu0 %v4522_v63  ;;  %v4605_v61 = vld [vmem:[%s6202_s7 + $0x324] ss:$28 sps:$4 sm:$0xff]   ;;  %v4608_v63 = vld [vmem:[%s6202_s7 + $0x51c] ss:$28 sps:$4 sm:$0xff]  }
 0x3c9   :  { %3310 = vmatprep.subr.bf16.mxu1 %v4527_v0  ;;  %3355 = vmatprep.subr.bf16.mxu0 %v4530_v1  ;;  %v4603_v0 = vld [vmem:[%s6202_s7 + $0x320] ss:$28 sps:$4 sm:$0xff]   ;;  %v4606_v1 = vld [vmem:[%s6202_s7 + $0x518] ss:$28 sps:$4 sm:$0xff]  }
 0x3cc   :  { %3311 = vmatpush1.bf16.msra.mxu1 %v4525_v2  ;;  %3356 = vmatpush1.bf16.msra.mxu0 %v4528_v3  ;;  %v4611_v2 = vld [vmem:[%s6202_s7 + $0x2ec] ss:$28 sps:$4 sm:$0xff]   ;;  %v4614_v3 = vld [vmem:[%s6202_s7 + $0x4e4] ss:$28 sps:$4 sm:$0xff]  }
 0x3cd   :  { %3312 = vmatprep.subr.bf16.mxu1 %v4533_v4  ;;  %3357 = vmatprep.subr.bf16.mxu0 %v4536_v5  ;;  %v4609_v4 = vld [vmem:[%s6202_s7 + $0x2e8] ss:$28 sps:$4 sm:$0xff]   ;;  %v4612_v5 = vld [vmem:[%s6202_s7 + $0x4e0] ss:$28 sps:$4 sm:$0xff]  }
 0x3d0   :  { %3313 = vmatpush1.bf16.msra.mxu1 %v4531_v8  ;;  %3358 = vmatpush1.bf16.msra.mxu0 %v4534_v9  ;;  %v4617_v8 = vld [vmem:[%s6202_s7 + $0x2b4] ss:$28 sps:$4 sm:$0xff]   ;;  %v4620_v9 = vld [vmem:[%s6202_s7 + $0x4ac] ss:$28 sps:$4 sm:$0xff]  }
 0x3d1   :  { %3314 = vmatprep.subr.bf16.mxu1 %v4539_v10  ;;  %3359 = vmatprep.subr.bf16.mxu0 %v4542_v11  ;;  %v4615_v10 = vld [vmem:[%s6202_s7 + $0x2b0] ss:$28 sps:$4 sm:$0xff]   ;;  %v4618_v11 = vld [vmem:[%s6202_s7 + $0x4a8] ss:$28 sps:$4 sm:$0xff]  }
 0x3d4   :  { %3315 = vmatpush1.bf16.msra.mxu1 %v4537_v12  ;;  %3360 = vmatpush1.bf16.msra.mxu0 %v4540_v15  ;;  %v4623_v12 = vld [vmem:[%s6202_s7 + $0x27c] ss:$28 sps:$4 sm:$0xff]   ;;  %v4626_v15 = vld [vmem:[%s6202_s7 + $0x474] ss:$28 sps:$4 sm:$0xff]  }
 0x3d5   :  { %3316 = vmatprep.subr.bf16.mxu1 %v4545_v16  ;;  %3375 = vmatprep.subr.bf16.mxu0 %v4548_v17  ;;  %v4621_v16 = vld [vmem:[%s6202_s7 + $0x278] ss:$28 sps:$4 sm:$0xff]   ;;  %v4624_v17 = vld [vmem:[%s6202_s7 + $0x470] ss:$28 sps:$4 sm:$0xff]  }
 0x3d8   :  { %3317 = vmatpush1.bf16.msra.mxu1 %v4543_v18  ;;  %3376 = vmatpush2.bf16.msra.mxu0 %v4546_v19  ;;  %v4629_v18 = vld [vmem:[%s6202_s7 + $0x244] ss:$28 sps:$4 sm:$0xff]   ;;  %v4632_v19 = vld [vmem:[%s6202_s7 + $0x43c] ss:$28 sps:$4 sm:$0xff]  }
 0x3d9   :  { %3318 = vmatprep.subr.bf16.mxu1 %v4551_v20  ;;  %3386 = vmatprep.subr.bf16.mxu0 %v4554_v21  ;;  %v4627_v20 = vld [vmem:[%s6202_s7 + $0x240] ss:$28 sps:$4 sm:$0xff]   ;;  %v4630_v21 = vld [vmem:[%s6202_s7 + $0x438] ss:$28 sps:$4 sm:$0xff]  }
 0x3db   :  { %3378 = vmatmul.mubr.bf16.vlgmr.msra.gmra.mxu0 %v5789_v52 }
 0x3dc   :  { %3319 = vmatpush1.bf16.msra.mxu1 %v4549_v22  ;;  %3387 = vmatpush1.bf16.msra.mxu0 %v4552_v23  ;;  %v4635_v22 = vld [vmem:[%s6202_s7 + $0x20c] ss:$28 sps:$4 sm:$0xff]   ;;  %v4638_v23 = vld [vmem:[%s6202_s7 + $0x404] ss:$28 sps:$4 sm:$0xff]  }
 0x3dd   :  { %3418 = vmatprep.mubr.bf16.mxu0 %v5762_v34  ;;  %3320 = vmatprep.subr.bf16.mxu1 %v4557_v24  ;;  %v4633_v24 = vld [vmem:[%s6202_s7 + $0x208] ss:$28 sps:$4 sm:$0xff]  }
 0x3de   :  { %3388 = vmatprep.subr.bf16.mxu0 %v4560_v25  ;;  %v4636_v25 = vld [vmem:[%s6202_s7 + $0x400] ss:$28 sps:$4 sm:$0xff]  }
 0x3e0   :  { %3321 = vmatpush2.bf16.msra.mxu1 %v4555_v7  ;;  %3389 = vmatpush1.bf16.msra.mxu0 %v4558_v26  ;;  %v4641_v7 = vld [vmem:[%s6202_s7 + $0x1d4] ss:$28 sps:$4 sm:$0xff]   ;;  %v4644_v26 = vld [vmem:[%s6202_s7 + $0x3cc] ss:$28 sps:$4 sm:$0xff]  }
 0x3e1   :  { %3322 = vmatprep.subr.bf16.mxu1 %v4563_v27  ;;  %3390 = vmatprep.subr.bf16.mxu0 %v4566_v28  ;;  %v4639_v27 = vld [vmem:[%s6202_s7 + $0x1d0] ss:$28 sps:$4 sm:$0xff]   ;;  %v4642_v28 = vld [vmem:[%s6202_s7 + $0x3c8] ss:$28 sps:$4 sm:$0xff]  }
 0x3e4   :  { %3323 = vmatpush2.bf16.msra.mxu1 %v4561_v14  ;;  %3391 = vmatpush1.bf16.msra.mxu0 %v4564_v30  ;;  %v4647_v14 = vld [vmem:[%s6202_s7 + $0x394] ss:$28 sps:$4 sm:$0xff]  }
 0x3e5   :  { %3324 = vmatprep.subr.bf16.mxu1 %v4569_v6  ;;  %3392 = vmatprep.subr.bf16.mxu0 %v4572_v31  ;;  %v4645_v30 = vld [vmem:[%s6202_s7 + $0x390] ss:$28 sps:$4 sm:$0xff]   ;;  %v4648_v6 = vld [vmem:[%s6202_s7 + $0x520] ss:$28 sps:$4 sm:$0xff]  }
 0x3e6   :  { %v4651_v31 = vld [vmem:[%s6202_s7 + $0x554] ss:$28 sps:$4 sm:$0xff]  }
 0x3e8   :  { %3325 = vmatpush2.bf16.msra.mxu1 %v4567_v32  ;;  %3393 = vmatpush1.bf16.msra.mxu0 %v4570_v33  ;;  %v4649_v32 = vld [vmem:[%s6202_s7 + $0x550] ss:$28 sps:$4 sm:$0xff]   ;;  %v4652_v33 = vld [vmem:[%s6202_s7 + $0x4e8] ss:$28 sps:$4 sm:$0xff]  }
 0x3e9   :  { %3326 = vmatprep.subr.bf16.mxu1 %v4575_v35  ;;  %3394 = vmatprep.subr.bf16.mxu0 %v4578_v37  ;;  %v4653_v35 = vld [vmem:[%s6202_s7 + $0x360] ss:$28 sps:$4 sm:$0xff]  }
 0x3ea   :  { %v4654_v37 = vld [vmem:[%s6202_s7 + $0x1a0] ss:$28 sps:$4 sm:$0xff]  }
 0x3ec   :  { %3327 = vmatpush2.bf16.msra.mxu1 %v4573_v38  ;;  %3395 = vmatpush1.bf16.msra.mxu0 %v4576_v39  ;;  %v4656_v38 = vld [vmem:[%s6202_s7 + $0x328] ss:$28 sps:$4 sm:$0xff]  }
 0x3ed   :  { %3328 = vmatprep.subr.bf16.mxu1 %v4581_v40  ;;  %3396 = vmatprep.subr.bf16.mxu0 %v4584_v41  ;;  %v4657_v39 = vld [vmem:[%s6202_s7 + $0x168] ss:$28 sps:$4 sm:$0xff]   ;;  %v4658_v40 = vld [vmem:[%s6202_s7 + $0x478] ss:$28 sps:$4 sm:$0xff]   ;;  %v4659_v41 = vld [vmem:[%s6202_s7 + $0x2f0] ss:$28 sps:$4 sm:$0xff]  }
 0x3f0   :  { %3329 = vmatpush2.bf16.msra.mxu1 %v4579_v42  ;;  %3397 = vmatpush1.bf16.msra.mxu0 %v4582_v43  ;;  %v4661_v42 = vld [vmem:[%s6202_s7 + $0x440] ss:$28 sps:$4 sm:$0xff]   ;;  %v4662_v43 = vld [vmem:[%s6202_s7 + $0x2b8] ss:$28 sps:$4 sm:$0xff]  }
 0x3f1   :  { %3330 = vmatprep.subr.bf16.mxu1 %v4587_v44  ;;  %3398 = vmatprep.subr.bf16.mxu0 %v4590_v45  ;;  %v4663_v44 = vld [vmem:[%s6202_s7 + $0xf8] ss:$28 sps:$4 sm:$0xff]   ;;  %v4664_v45 = vld [vmem:[%s6202_s7 + $0x408] ss:$28 sps:$4 sm:$0xff]  }
 0x3f4   :  { %3331 = vmatpush2.bf16.msra.mxu1 %v4585_v46  ;;  %3399 = vmatpush1.bf16.msra.mxu0 %v4588_v47  ;;  %v4665_v46 = vld [vmem:[%s6202_s7 + $0x280] ss:$28 sps:$4 sm:$0xff]  }
 0x3f5   :  { %3332 = vmatprep.subr.bf16.mxu1 %v4593_v49  ;;  %3400 = vmatprep.subr.bf16.mxu0 %v4596_v50  ;;  %v4666_v47 = vld [vmem:[%s6202_s7 + $0xc0] ss:$28 sps:$4 sm:$0xff]   ;;  %v4667_v49 = vld [vmem:[%s6202_s7 + $0x3d0] ss:$28 sps:$4 sm:$0xff]   ;;  %v4668_v50 = vld [vmem:[%s6202_s7 + $0x248] ss:$28 sps:$4 sm:$0xff]  }
 0x3f8   :  { %3333 = vmatpush2.bf16.msra.mxu1 %v4591_v53  ;;  %3401 = vmatpush1.bf16.msra.mxu0 %v4594_v54  ;;  %v4669_v53 = vld [vmem:[%s6202_s7 + $0x88] ss:$28 sps:$4 sm:$0xff]   ;;  %v4670_v54 = vld [vmem:[%s6202_s7 + $0x398] ss:$28 sps:$4 sm:$0xff]  }
 0x3f9   :  { %3334 = vmatprep.subr.bf16.mxu1 %v4599_v55  ;;  %3402 = vmatprep.subr.bf16.mxu0 %v4602_v56  ;;  %v4671_v55 = vld [vmem:[%s6202_s7 + $0x210] ss:$28 sps:$4 sm:$0xff]  }
 0x3fa   :  { %v4672_v56 = vld [vmem:[%s6202_s7 + $0x50] ss:$28 sps:$4 sm:$0xff]  }
 0x3fc   :  { %3335 = vmatpush2.bf16.msra.mxu1 %v4597_v57  ;;  %3403 = vmatpush2.bf16.msra.mxu0 %v4600_v58  ;;  %v4673_v57 = vld [vmem:[%s6202_s7 + $0x558] ss:$28 sps:$4 sm:$0xff]  }
 0x3fd   :  { %3404 = vmatprep.subr.bf16.mxu0 %v4605_v61  ;;  %3427 = vmatprep.subr.bf16.mxu1 %v4608_v63  ;;  %v4674_v58 = vld [vmem:[%s6202_s7 + $0x1d8] ss:$28 sps:$4 sm:$0xff]   ;;  %v6172_v63 = vld [vmem:[%s6203_s8] sm:$0x7f] }
 0x3fe   :  { %v4675_v61 = vld [vmem:[%s6202_s7 + $0x18] ss:$28 sps:$4 sm:$0xff]  }
 0x3ff   :  { %3337 = vmatmul.mubr.bf16.vlgmr.msra.gmra.mxu1 %v5768_v36 }
 0x400   :  { %3405 = vmatpush2.bf16.msra.mxu0 %v4603_v0  ;;  %3428 = vmatpush1.bf16.msra.mxu1 %v4606_v1 }
 0x401   :  { %4039 = vmatprep.mubr.msk.bf16.mxu1 %vm1266_vm0, %v5781_v48  ;;  %3406 = vmatprep.subr.bf16.mxu0 %v4611_v2 }
 0x402   :  { %3429 = vmatprep.subr.bf16.mxu1 %v4614_v3  ;;  %v2291_v3 = vrot.slane %v6172_v63, %v5549_v62 }
 0x404   :  { %3407 = vmatpush2.bf16.msra.mxu0 %v4609_v4  ;;  %3430 = vmatpush1.bf16.msra.mxu1 %v4612_v5 }
 0x405   :  { %3408 = vmatprep.subr.bf16.mxu0 %v4617_v8  ;;  %3431 = vmatprep.subr.bf16.mxu1 %v4620_v9 }
 0x408   :  { %3409 = vmatpush2.bf16.msra.mxu0 %v4615_v10  ;;  %3432 = vmatpush1.bf16.msra.mxu1 %v4618_v11 }
 0x409   :  { %3410 = vmatprep.subr.bf16.mxu0 %v4623_v12  ;;  %3433 = vmatprep.subr.bf16.mxu1 %v4626_v15 }
 0x40c   :  { %3411 = vmatpush2.bf16.msra.mxu0 %v4621_v16  ;;  %3434 = vmatpush1.bf16.msra.mxu1 %v4624_v17 }
 0x40d   :  { %3412 = vmatprep.subr.bf16.mxu0 %v4629_v18  ;;  %3435 = vmatprep.subr.bf16.mxu1 %v4632_v19 }
 0x410   :  { %3413 = vmatpush2.bf16.msra.mxu0 %v4627_v20  ;;  %3436 = vmatpush1.bf16.msra.mxu1 %v4630_v21 }
 0x411   :  { %3414 = vmatprep.subr.bf16.mxu0 %v4635_v22  ;;  %3437 = vmatprep.subr.bf16.mxu1 %v4638_v23 }
 0x414   :  { %3415 = vmatpush2.bf16.msra.mxu0 %v4633_v24  ;;  %3438 = vmatpush1.bf16.msra.mxu1 %v4636_v25 }
 0x415   :  { %3416 = vmatprep.subr.bf16.mxu0 %v4641_v7  ;;  %3439 = vmatprep.subr.bf16.mxu1 %v4644_v26 }
 0x418   :  { %3417 = vmatpush2.bf16.msra.mxu0 %v4639_v27  ;;  %3440 = vmatpush1.bf16.msra.mxu1 %v4642_v28 }
 0x419   :  { %3441 = vmatprep.subr.bf16.mxu1 %v4647_v14  ;;  %3508 = vmatprep.subr.bf16.mxu0 %v4751_v13 }
 0x41b   :  { %3419 = vmatmul.mubr.bf16.vlgmr.msra.gmra.mxu0 %v5768_v36 }
 0x41c   :  { %3442 = vmatpush1.bf16.msra.mxu1 %v4645_v30  ;;  %3509 = vmatpush1.bf16.msra.mxu0 %v4648_v6 }
 0x41d   :  { %4040 = vmatprep.mubr.msk.bf16.mxu0 %vm1266_vm0, %v5781_v48  ;;  %3457 = vmatprep.subr.bf16.mxu1 %v4651_v31  ;;  %v4655_v48 = vld [vmem:[%s6202_s7 + $0x4b0] ss:$28 sps:$4 sm:$0xff]  }
 0x41e   :  { %3510 = vmatprep.subr.bf16.mxu0 %v4751_v13 }
 0x420   :  { %3458 = vmatpush2.bf16.msra.mxu1 %v4649_v32  ;;  %3511 = vmatpush1.bf16.msra.mxu0 %v4652_v33 }
 0x421   :  { %4063 = vmatprep.subr.bf16.mxu1 %v4653_v35  ;;  %3512 = vmatprep.subr.bf16.mxu0 %v4751_v13 }
 0x423   :  { %3460 = vmatmul.mubr.bf16.vlgmr.msra.gmra.mxu1 %v5789_v52 }
 0x424   :  { %4064 = vmatpush3.bf16.msra.mxu1 %v4654_v37  ;;  %3500 = vmatprep.mubr.bf16.mxu1 %v5762_v34  ;;  %v4660_v34 = vld [vmem:[%s6202_s7 + $0x130] ss:$28 sps:$4 sm:$0xff]   ;;  %s4754_s7 = smov [#allocation4]  }
 0x425   :  { %3513 = vmatpush1.bf16.msra.mxu0 %v4655_v48  ;;  %4065 = vmatprep.subr.bf16.mxu1 %v4656_v38  ;;  %s3606_s8 = sshll.u32 %s4754_s7, 4  ;;  %s3607_s8 = int_to_ptr.vmem [resolvable:$true] %s3606_s8 }
 0x426   :  { %3514 = vmatprep.subr.bf16.mxu0 %v4751_v13  ;;  %s4707_s0 = scalar_lea.vmem %s3607_s8, 128  ;;  %p4712_p1 = scmp.lt.s32.totalorder %s3607_s8, %s3607_s8 }
 0x427   :  { %p4708_p0 = scmp.ne.s32.totalorder %s3607_s8, %s4707_s0  ;;  %p4713_p2 = scmp.lt.s32.totalorder %s4707_s0, %s4707_s0 }
 0x428   :  { %4066 = vmatpush3.bf16.msra.mxu1 %v4657_v39 }
 0x429   :  { %3515 = vmatpush1.bf16.msra.mxu0 %v4658_v40  ;;  %4067 = vmatprep.subr.bf16.mxu1 %v4659_v41  ;;  %p4714_p3 = por %p4713_p2, %p4712_p1 }
 0x42a   :  { %3516 = vmatprep.subr.bf16.mxu0 %v4751_v13 }
 0x42b   :  { %p4715_p4 = pnand %p4714_p3, %p4708_p0 }
 0x42c   :  { %4068 = vmatpush3.bf16.msra.mxu1 %v4660_v34 }
 0x42d   :  { %3517 = vmatpush1.bf16.msra.mxu0 %v4661_v42  ;;  %4069 = vmatprep.subr.bf16.mxu1 %v4662_v43 }
 0x42e   :  { %3518 = vmatprep.subr.bf16.mxu0 %v4751_v13 }
 0x430   :  { %4070 = vmatpush3.bf16.msra.mxu1 %v4663_v44 }
 0x431   :  { %3519 = vmatpush1.bf16.msra.mxu0 %v4664_v45  ;;  %4071 = vmatprep.subr.bf16.mxu1 %v4665_v46 }
 0x432   :  { %3520 = vmatprep.subr.bf16.mxu0 %v4751_v13 }
 0x434   :  { %4072 = vmatpush3.bf16.msra.mxu1 %v4666_v47 }
 0x435   :  { %3521 = vmatpush1.bf16.msra.mxu0 %v4667_v49  ;;  %4073 = vmatprep.subr.bf16.mxu1 %v4668_v50 }
 0x436   :  { %3522 = vmatprep.subr.bf16.mxu0 %v4751_v13 }
 0x438   :  { %4074 = vmatpush3.bf16.msra.mxu1 %v4669_v53 }
 0x439   :  { %3523 = vmatpush1.bf16.msra.mxu0 %v4670_v54  ;;  %4075 = vmatprep.subr.bf16.mxu1 %v4671_v55 }
 0x43a   :  { %3538 = vmatprep.subr.bf16.mxu0 %v4751_v13  ;;  %v2287_v13 = vrot.slane %v6172_v63, %v5543_v60 }
 0x43c   :  { %4076 = vmatpush3.bf16.msra.mxu1 %v4672_v56 }
 0x43d   :  { %3539 = vmatpush2.bf16.msra.mxu0 %v4673_v57  ;;  %4077 = vmatprep.subr.bf16.mxu1 %v4674_v58 }
 0x440   :  { %3541 = vmatmul.mubr.bf16.vlgmr.msra.gmra.mxu0 %v5789_v52  ;;  %4078 = vmatpush3.bf16.msra.mxu1 %v4675_v61 }
 0x443   :  { %3501 = vmatmul.mubr.bf16.vlgmr.msra.gmra.mxu1 %v5768_v36 }
 0x477   :  { %v3256_v0 = vpop.f32.mrf.mxu0 }
 0x478   :  { %v3257_v5 = vadd.f32 %v3256_v0, %v2287_v13 }
 0x479   :  { %v3258_v1 = vpop.f32.mrf.mxu0 }
 0x47a   :  { %v3259_v8 = vadd.f32 %v3258_v1, %v2291_v3 }
 0x47b   :  { %v3260_v2 = vpop.f32.mrf.mxu0 }
 0x47d   :  { %v3261_v4 = vpop.f32.mrf.mxu0 }
 0x47f   :  { %v3297_v52 = vpop.f32.mrf.mxu1 }
 0x480   :  { %v3298_v9 = vadd.f32 %v3297_v52, %v3257_v5 }
 0x481   :  { %v3299_v36 = vpop.f32.mrf.mxu1 }
 0x482   :  { %v3548_v10 = vsub.f32 0.0, %v3298_v9  ;;  %v3300_v11 = vadd.f32 %v3299_v36, %v3259_v8 }
 0x483   :  { %v3301_v12 = vpop.f32.mrf.mxu1 }
 0x484   :  { %v3555_v15 = vmul.f32 1.442695, %v3548_v10  ;;  %v3549_v16 = vsub.f32 0.0, %v3300_v11 }
 0x485   :  { %v3302_v17 = vpop.f32.mrf.mxu1 }
 0x486   :  { %4678 = vpow2.f32 %v3555_v15  ;;  %v3557_v18 = vmul.f32 1.442695, %v3549_v16 }
 0x488   :  { %4680 = vpow2.f32 %v3557_v18 }
 0x493   :  { %v4679_v60 = vpop.eup %4678 }
 0x494   :  { %v3569_v19 = vadd.f32 1.0, %v4679_v60 }
 0x495   :  { %v4681_v20 = vpop.eup %4680 }
 0x496   :  { %4682 = vrcp.f32 %v3569_v19  ;;  %v3570_v62 = vadd.f32 1.0, %v4681_v20 }
 0x498   :  { %4684 = vrcp.f32 %v3570_v62 }
 0x49b   :  { %v3379_v21 = vpop.f32.mrf.mxu0 }
 0x49d   :  { %v3381_v22 = vpop.f32.mrf.mxu0 }
 0x49f   :  { %v3383_v23 = vpop.f32.mrf.mxu0 }
 0x4a1   :  { %v3384_v24 = vpop.f32.mrf.mxu0 }
 0x4a3   :  { %v4683_v25 = vpop.eup %4682 }
 0x4a4   :  { %3583 = vst [vmem:[#allocation2] sm:$0xff] %v4683_v25 }
 0x4a5   :  { %v4685_v7 = vpop.eup %4684 }
 0x4a6   :  { %3584 = vst [vmem:[#allocation2 + $0x8] sm:$0xff] %v4685_v7 }
 0x4a7   :  { %4718 = shalt.err (!%p4715_p4)
}
 0x4a8   :  { %3609 = dma.vmem_to_hbm [thread:$0]  %s3607_s8, 128, %s6206_s11, [#allocation5]   ;;  %v2295_v26 = vrot.slane %v6172_v63, %v5554_v51  ;;  %v2299_v27 = vrot.slane %v6172_v63, %v5557_v29  ;;  %v2302_v29 = vsub.s32 4, %v5540_v59  ;;  %v2306_v43 = vsub.s32 5, %v5540_v59 }
 0x4a9   :  { %v2310_v10 = vsub.s32 6, %v5540_v59  ;;  %s4755_s11 = smov [#allocation2]  }
 0x4aa   :  { %v2303_v45 = vrot.slane %v6172_v63, %v2302_v29  ;;  %v2307_v47 = vrot.slane %v6172_v63, %v2306_v43  ;;  %s3596_s3 = sshll.u32 %s4755_s11, 4  ;;  %s3597_s3 = int_to_ptr.vmem [resolvable:$true] %s3596_s3 }
 0x4ab   :  { %v2311_v16 = vrot.slane %v6172_v63, %v2310_v10  ;;  %s4727_s5 = scalar_lea.vmem %s3597_s3, 896  ;;  %p4732_p6 = scmp.lt.s32.totalorder %s3597_s3, %s3597_s3 }
 0x4ac   :  { %p4728_p5 = scmp.ne.s32.totalorder %s3597_s3, %s4727_s5  ;;  %p4733_p7 = scmp.lt.s32.totalorder %s4727_s5, %s4727_s5 }
 0x4ae   :  { %p4734_p8 = por %p4733_p7, %p4732_p6 }
 0x4b0   :  { %p4735_p9 = pnand %p4734_p8, %p4728_p5 }
 0x4bf   :  { %v3338_v28 = vpop.f32.mrf.mxu1 }
 0x4c0   :  { %v3339_v14 = vadd.f32 %v3338_v28, %v2295_v26 }
 0x4c1   :  { %v3340_v30 = vpop.f32.mrf.mxu1 }
 0x4c2   :  { %v3380_v6 = vadd.f32 %v3379_v21, %v3339_v14  ;;  %v3341_v31 = vadd.f32 %v3340_v30, %v2299_v27 }
 0x4c3   :  { %v3342_v32 = vpop.f32.mrf.mxu1 }
 0x4c4   :  { %v3550_v33 = vsub.f32 0.0, %v3380_v6  ;;  %v3382_v35 = vadd.f32 %v3381_v22, %v3341_v31 }
 0x4c5   :  { %v3343_v37 = vpop.f32.mrf.mxu1 }
 0x4c6   :  { %v3559_v48 = vmul.f32 1.442695, %v3550_v33  ;;  %v3551_v38 = vsub.f32 0.0, %v3382_v35 }
 0x4c8   :  { %4686 = vpow2.f32 %v3559_v48  ;;  %v3561_v39 = vmul.f32 1.442695, %v3551_v38 }
 0x4ca   :  { %4688 = vpow2.f32 %v3561_v39 }
 0x4d5   :  { %v4687_v40 = vpop.eup %4686 }
 0x4d6   :  { %v3571_v41 = vadd.f32 1.0, %v4687_v40 }
 0x4d7   :  { %v4689_v51 = vpop.eup %4688 }
 0x4d8   :  { %4690 = vrcp.f32 %v3571_v41  ;;  %v3572_v34 = vadd.f32 1.0, %v4689_v51 }
 0x4da   :  { %4692 = vrcp.f32 %v3572_v34 }
 0x4db   :  { %v3420_v42 = vpop.f32.mrf.mxu0 }
 0x4dc   :  { %v3421_v50 = vadd.f32 %v3420_v42, %v2303_v45 }
 0x4dd   :  { %v3422_v44 = vpop.f32.mrf.mxu0 }
 0x4de   :  { %v3423_v54 = vadd.f32 %v3422_v44, %v2307_v47 }
 0x4df   :  { %v3424_v46 = vpop.f32.mrf.mxu0 }
 0x4e1   :  { %v3425_v49 = vpop.f32.mrf.mxu0 }
 0x4e3   :  { %v3461_v53 = vpop.f32.mrf.mxu1 }
 0x4e4   :  { %v3462_v55 = vadd.f32 %v3461_v53, %v3421_v50 }
 0x4e5   :  { %v4691_v56 = vpop.eup %4690  ;;  %v3463_v57 = vpop.f32.mrf.mxu1 }
 0x4e6   :  { %3585 = vst [vmem:[#allocation2 + $0x10] sm:$0xff] %v4691_v56  ;;  %v3552_v58 = vsub.f32 0.0, %v3462_v55  ;;  %v3464_v61 = vadd.f32 %v3463_v57, %v3423_v54 }
 0x4e7   :  { %v4693_v0 = vpop.eup %4692  ;;  %v3465_v1 = vpop.f32.mrf.mxu1 }
 0x4e8   :  { %3586 = vst [vmem:[#allocation2 + $0x18] sm:$0xff] %v4693_v0  ;;  %v3563_v13 = vmul.f32 1.442695, %v3552_v58  ;;  %v3553_v2 = vsub.f32 0.0, %v3464_v61 }
 0x4e9   :  { %v3466_v3 = vpop.f32.mrf.mxu1 }
 0x4ea   :  { %4694 = vpow2.f32 %v3563_v13  ;;  %v3565_v4 = vmul.f32 1.442695, %v3553_v2 }
 0x4ec   :  { %4696 = vpow2.f32 %v3565_v4 }
 0x4f7   :  { %v4695_v5 = vpop.eup %4694 }
 0x4f8   :  { %v3573_v52 = vadd.f32 1.0, %v4695_v5 }
 0x4f9   :  { %v4697_v8 = vpop.eup %4696 }
 0x4fa   :  { %4698 = vrcp.f32 %v3573_v52  ;;  %v3574_v9 = vadd.f32 1.0, %v4697_v8 }
 0x4fc   :  { %4700 = vrcp.f32 %v3574_v9 }
 0x500   :  { %v3542_v36 = vpop.f32.mrf.mxu0 }
 0x502   :  { %v3544_v11 = vpop.f32.mrf.mxu0 }
 0x503   :  { %v4079_v12 = vpop.f32.mrf.mxu1 }
 0x504   :  { %v3545_v15 = vpop.f32.mrf.mxu0 }
 0x505   :  { %v4080_v17 = vpop.f32.mrf.mxu1 }
 0x506   :  { %v4081_v18 = vadd.f32 %v4080_v17, %v4079_v12  ;;  %v3546_v60 = vpop.f32.mrf.mxu0 }
 0x507   :  { %v4699_v19 = vpop.eup %4698  ;;  %v4082_v20 = vpop.f32.mrf.mxu1 }
 0x508   :  { %3587 = vst [vmem:[#allocation2 + $0x20] sm:$0xff] %v4699_v19  ;;  %v3503_v62 = vadd.f32 %v4081_v18, %v2311_v16 }
 0x509   :  { %v4701_v21 = vpop.eup %4700  ;;  %v4083_v22 = vpop.f32.mrf.mxu1 }
 0x50a   :  { %3588 = vst [vmem:[#allocation2 + $0x28] sm:$0xff] %v4701_v21  ;;  %v3543_v23 = vadd.f32 %v3542_v36, %v3503_v62 }
 0x50c   :  { %v3554_v24 = vsub.f32 0.0, %v3543_v23 }
 0x50e   :  { %v3567_v25 = vmul.f32 1.442695, %v3554_v24 }
 0x510   :  { %4702 = vpow2.f32 %v3567_v25 }
 0x51d   :  { %v4703_v59 = vpop.eup %4702 }
 0x51e   :  { %v3575_v7 = vadd.f32 1.0, %v4703_v59 }
 0x520   :  { %4704 = vrcp.f32 %v3575_v7 }
 0x52d   :  { %v4705_v63 = vpop.eup %4704 }
 0x52e   :  { %3589 = vst.msk [vmem:[#allocation2 + $0x30] sm:$0xff] %vm1266_vm0, %v4705_v63 }
 0x52f   :  { %4738 = shalt.err (!%p4735_p9)
}
 0x530   :  { %3599 = dma.vmem_to_hbm [thread:$0]  %s3597_s3, 896, %s6205_s10, [#allocation3]  }
 0x531   :  { %4747 = dma.done.wait [#allocation3], 896  }
 0x532   :  { %4748 = vsyncadd [#allocation3], 4294966400 }
 0x533   :  { %4749 = dma.done.wait [#allocation5], 128  }
 0x534   :  { %4750 = vsyncadd [#allocation5], 4294967168 }
 0x535   :  { %3616 = vsyncpa [#allocation3], 1 }
 0x536   :  { %3617 = vsyncpa [#allocation5], 1 }

</bundles_post_ra>
